<compile_context>
chip_gen: v7x
topology: tpu7x:2x2x1
jax: 0.10.0
libtpu: 0.0.40
codegen_flags: <defaults>
</compile_context>

<pallas_src>
import functools

import jax
import jax.numpy as jnp
from jax.experimental import pallas as pl
from jax.experimental.pallas import tpu as pltpu

CPAD = 128   # lane-dense padded channel width (conv outputs, fc2 logits)
FPAD = 512   # padded fc1 hidden width


# ---------------------------------------------------------------------------
# Pallas kernels
# ---------------------------------------------------------------------------
def _conv_pool_kernel(p_ref, w_ref, b_ref, o_ref, *, pool_rows):
    """Fused conv-as-matmul + bias + ReLU + 2x2 max pool for one image.

    Patch rows are pre-ordered (dy, dx, yp, xp), so pooling is an elementwise
    max over four contiguous row blocks of `pool_rows` rows each.
    """
    acc = jnp.dot(p_ref[...], w_ref[...], preferred_element_type=jnp.float32)
    acc = jnp.maximum(acc + b_ref[...], 0.0)
    q = pool_rows
    pooled = jnp.maximum(
        jnp.maximum(acc[0:q], acc[q:2 * q]),
        jnp.maximum(acc[2 * q:3 * q], acc[3 * q:4 * q]),
    )
    o_ref[...] = pooled.astype(o_ref.dtype)


def conv_relu_pool(patches, w, b, pool_rows):
    """patches: (N, 4*pool_rows, K) bf16; w: (K, CPAD) bf16; b: (1, CPAD) f32.

    Returns (N, pool_rows, CPAD) bf16.  Grid over batch, "parallel": weights
    stay resident (constant block index), per-image patches are pipelined.
    """
    n, m, k = patches.shape
    kern = functools.partial(_conv_pool_kernel, pool_rows=pool_rows)
    return pl.pallas_call(
        kern,
        out_shape=jax.ShapeDtypeStruct((n, pool_rows, CPAD), jnp.bfloat16),
        grid=(n,),
        in_specs=[
            pl.BlockSpec((None, m, k), lambda i: (i, 0, 0)),
            pl.BlockSpec((k, CPAD), lambda i: (0, 0)),
            pl.BlockSpec((1, CPAD), lambda i: (0, 0)),
        ],
        out_specs=pl.BlockSpec((None, pool_rows, CPAD), lambda i: (i, 0, 0)),
        compiler_params=pltpu.CompilerParams(
            dimension_semantics=("parallel",)),
    )(patches, w, b)


def _fc_kernel(x_ref, w1_ref, b1_ref, w2_ref, b2_ref, o_ref):
    """Fused fc1 + ReLU + fc2 + log_softmax (bf16 MXU ops, f32 epilogue)."""
    h = jnp.dot(x_ref[...], w1_ref[...], preferred_element_type=jnp.float32)
    h = jnp.maximum(h + b1_ref[...], 0.0).astype(jnp.bfloat16)
    z = jnp.dot(h, w2_ref[...], preferred_element_type=jnp.float32)
    z = z + b2_ref[...]                    # padded classes carry a -1e30 bias
    m = jnp.max(z, axis=-1, keepdims=True)
    s = z - m
    lse = jnp.log(jnp.sum(jnp.exp(s), axis=-1, keepdims=True))
    o_ref[...] = s - lse


def fc_block(feat, w1, b1, w2, b2):
    """feat: (N, 800) bf16 -> (N, CPAD) f32 log-probabilities (first 10 real)."""
    n, k = feat.shape
    tm = n if n < 128 else 128
    return pl.pallas_call(
        _fc_kernel,
        out_shape=jax.ShapeDtypeStruct((n, CPAD), jnp.float32),
        grid=(pl.cdiv(n, tm),),
        in_specs=[
            pl.BlockSpec((tm, k), lambda i: (i, 0)),
            pl.BlockSpec((k, FPAD), lambda i: (0, 0)),
            pl.BlockSpec((1, FPAD), lambda i: (0, 0)),
            pl.BlockSpec((FPAD, CPAD), lambda i: (0, 0)),
            pl.BlockSpec((1, CPAD), lambda i: (0, 0)),
        ],
        out_specs=pl.BlockSpec((tm, CPAD), lambda i: (i, 0)),
        compiler_params=pltpu.CompilerParams(
            dimension_semantics=("parallel",)),
    )(feat, w1, b1, w2, b2)


# ---------------------------------------------------------------------------
# Glue: patch extraction (pure indexing, no minor-dim transpose)
# ---------------------------------------------------------------------------
def _im2col_pool_ordered(x_nhwc, kh, kw):
    """Valid-conv patches with K ordered (ki, kj, c) and rows ordered
    (dy, dx, yp, xp) so the kernel can pool over contiguous row blocks."""
    n, h, w, c = x_nhwc.shape
    ho, wo = h - kh + 1, w - kw + 1
    hp, wp = ho // 2, wo // 2
    cols = [x_nhwc[:, ki:ki + ho, kj:kj + wo, :]
            for ki in range(kh) for kj in range(kw)]
    p = jnp.stack(cols, axis=3)                        # (N, Ho, Wo, kh*kw, C)
    p = p.reshape(n, ho, wo, kh * kw * c)              # channel stays minor
    p = p.reshape(n, hp, 2, wp, 2, kh * kw * c)
    p = jnp.transpose(p, (0, 2, 4, 1, 3, 5))           # (N, dy, dx, yp, xp, K)
    return p.reshape(n, 4 * hp * wp, kh * kw * c), hp * wp


# ---------------------------------------------------------------------------
# Parameters: PyTorch-style init, then one-time layout prep (outside jit)
# ---------------------------------------------------------------------------
def init_params(key):
    def uniform(k, shape, fan_in):
        bound = 1.0 / jnp.sqrt(jnp.float32(fan_in))
        return jax.random.uniform(k, shape, jnp.float32, -bound, bound)

    ks = jax.random.split(key, 8)
    return {
        "conv1_w": uniform(ks[0], (20, 1, 5, 5), 1 * 5 * 5),
        "conv1_b": uniform(ks[1], (20,), 1 * 5 * 5),
        "conv2_w": uniform(ks[2], (50, 20, 5, 5), 20 * 5 * 5),
        "conv2_b": uniform(ks[3], (50,), 20 * 5 * 5),
        "fc1_w": uniform(ks[4], (500, 4 * 4 * 50), 4 * 4 * 50),
        "fc1_b": uniform(ks[5], (500,), 4 * 4 * 50),
        "fc2_w": uniform(ks[6], (10, 500), 500),
        "fc2_b": uniform(ks[7], (10,), 500),
    }


def prep_params(params):
    """One-time torch-layout -> kernel-layout transform (run outside jit)."""
    f32, bf16 = jnp.float32, jnp.bfloat16

    def pad_cols(a, width):
        return jnp.pad(a, ((0, 0), (0, width - a.shape[1])))

    # conv1: (20,1,5,5) -> (25, CPAD), rows ordered (ki, kj)
    w1 = pad_cols(params["conv1_w"].reshape(20, 25).T, CPAD).astype(bf16)
    b1 = pad_cols(params["conv1_b"].reshape(1, 20), CPAD).astype(f32)

    # conv2: (50,20,5,5) -> (500, CPAD), rows ordered (ki, kj, ci)
    w2 = params["conv2_w"].transpose(2, 3, 1, 0).reshape(500, 50)
    w2 = pad_cols(w2, CPAD).astype(bf16)
    b2 = pad_cols(params["conv2_b"].reshape(1, 50), CPAD).astype(f32)

    # fc1: torch in-index is c*16 + p (NCHW flatten); reorder rows to p*50 + c
    # so the pooled NHWC features need no transpose before fc1.
    w3 = params["fc1_w"].reshape(500, 50, 16).transpose(2, 1, 0).reshape(800, 500)
    w3 = pad_cols(w3, FPAD).astype(bf16)
    b3 = pad_cols(params["fc1_b"].reshape(1, 500), FPAD).astype(f32)

    # fc2: (10,500) -> (FPAD, CPAD); padded class columns get a -1e30 bias so
    # they vanish in the in-kernel log_softmax.
    w4 = jnp.zeros((FPAD, CPAD), f32).at[:500, :10].set(params["fc2_w"].T)
    w4 = w4.astype(bf16)
    b4 = jnp.full((1, CPAD), -1e30, f32).at[0, :10].set(params["fc2_b"])

    return {"w1": w1, "b1": b1, "w2": w2, "b2": b2,
            "w3": w3, "b3": b3, "w4": w4, "b4": b4}


# ---------------------------------------------------------------------------
# Forward pass (matches MNIST_Conv.forward semantics)
# ---------------------------------------------------------------------------
def mnist_conv_forward(pp, x_nchw):
    n = x_nchw.shape[0]
    x = x_nchw.transpose(0, 2, 3, 1).astype(jnp.bfloat16)   # NCHW -> NHWC, C=1

    # conv1 (1->20, 5x5) + ReLU + 2x2 pool, fused in one kernel
    p1, pr1 = _im2col_pool_ordered(x, 5, 5)                  # (N, 576, 25)
    y = conv_relu_pool(p1, pp["w1"], pp["b1"], pr1)          # (N, 144, 128) bf16

    # conv2 (20->50, 5x5) + ReLU + 2x2 pool, fused in one kernel
    y = y[:, :, :20].reshape(n, 12, 12, 20)                  # pooled map, NHWC
    p2, pr2 = _im2col_pool_ordered(y, 5, 5)                  # (N, 64, 500)
    y = conv_relu_pool(p2, pp["w2"], pp["b2"], pr2)          # (N, 16, 128) bf16

    # fc1 + ReLU + fc2 + log_softmax (flatten order absorbed into fc1 weights)
    feat = y[:, :, :50].reshape(n, 16 * 50)                  # (N, 800) bf16
    out = fc_block(feat, pp["w3"], pp["b3"], pp["w4"], pp["b4"])
    return out[:, :10]


if __name__ == "__main__":
    key = jax.random.PRNGKey(0)
    # Input shape fixed by the architecture (fc1 expects 4*4*50): (2, 1, 28, 28)
    x = jax.random.normal(key, (2, 1, 28, 28), dtype=jnp.float32)
    params = init_params(jax.random.PRNGKey(42))
    pp = prep_params(params)            # one-time weight layout transform

    fwd = jax.jit(mnist_conv_forward)
    out = jax.block_until_ready(fwd(pp, x))

    assert out.shape == (2, 10), out.shape
    # log_softmax rows must exponentiate to a probability distribution
    assert jnp.allclose(jnp.sum(jnp.exp(out), axis=1), 1.0, atol=1e-4)
    print("KERNEL_OK")
</pallas_src>

<mosaic_0001>
module attributes {stable_mosaic.version = 11 : i64} {
  func.func @_conv_pool_kernel(%arg0: i32, %arg1: memref<1x576x25xbf16, #tpu.memory_space<vmem>>, %arg2: memref<25x128xbf16, #tpu.memory_space<vmem>>, %arg3: memref<1x128xf32, #tpu.memory_space<vmem>>, %arg4: memref<1x144x128xbf16, #tpu.memory_space<vmem>>) attributes {dimension_semantics = [#tpu.dimension_semantics<parallel>], iteration_bounds = array<i64: 2>, scalar_prefetch = 0 : i64, scratch_operands = 0 : i64, tpu.core_type = #tpu.core_type<tc>, window_params = [{transform_indices = @transform_0, window_bounds = array<i64: 1, 576, 25>}, {pipeline_mode = #tpu.pipeline_mode<synchronous>, transform_indices = @transform_1, window_bounds = array<i64: 25, 128>}, {pipeline_mode = #tpu.pipeline_mode<synchronous>, transform_indices = @transform_2, window_bounds = array<i64: 1, 128>}, {transform_indices = @transform_3, window_bounds = array<i64: 1, 144, 128>}]} {
    %c0 = arith.constant 0 : index
    %c0_0 = arith.constant 0 : index
    %c0_1 = arith.constant 0 : index
    %0 = vector.load %arg1[%c0, %c0_0, %c0_1] : memref<1x576x25xbf16, #tpu.memory_space<vmem>>, vector<1x576x25xbf16>
    %1 = vector.shape_cast %0 : vector<1x576x25xbf16> to vector<576x25xbf16>
    %c0_2 = arith.constant 0 : index
    %c0_3 = arith.constant 0 : index
    %2 = vector.load %arg2[%c0_2, %c0_3] : memref<25x128xbf16, #tpu.memory_space<vmem>>, vector<25x128xbf16>
    %cst = arith.constant dense<0.000000e+00> : vector<576x128xf32>
    %3 = tpu.matmul %1, %2, %cst {dimension_numbers = #tpu.dot_dimension_numbers<[1], [0], [0], [1], [0, 0, 1, 1], [], []>} : vector<576x25xbf16>, vector<25x128xbf16>, vector<576x128xf32> -> vector<576x128xf32>
    %c0_4 = arith.constant 0 : index
    %c0_5 = arith.constant 0 : index
    %4 = vector.load %arg3[%c0_4, %c0_5] : memref<1x128xf32, #tpu.memory_space<vmem>>, vector<1x128xf32>
    %5 = vector.broadcast %4 : vector<1x128xf32> to vector<576x128xf32>
    %6 = arith.addf %3, %5 : vector<576x128xf32>
    %cst_6 = arith.constant 0.000000e+00 : f32
    %7 = vector.broadcast %cst_6 : f32 to vector<576x128xf32>
    %8 = arith.maximumf %6, %7 : vector<576x128xf32>
    %9 = vector.extract_strided_slice %8 {offsets = [0, 0], sizes = [144, 128], strides = [1, 1]} : vector<576x128xf32> to vector<144x128xf32>
    %10 = vector.extract_strided_slice %8 {offsets = [144, 0], sizes = [144, 128], strides = [1, 1]} : vector<576x128xf32> to vector<144x128xf32>
    %11 = arith.maximumf %9, %10 : vector<144x128xf32>
    %12 = vector.extract_strided_slice %8 {offsets = [288, 0], sizes = [144, 128], strides = [1, 1]} : vector<576x128xf32> to vector<144x128xf32>
    %13 = vector.extract_strided_slice %8 {offsets = [432, 0], sizes = [144, 128], strides = [1, 1]} : vector<576x128xf32> to vector<144x128xf32>
    %14 = arith.maximumf %12, %13 : vector<144x128xf32>
    %15 = arith.maximumf %11, %14 : vector<144x128xf32>
    %16 = arith.truncf %15 : vector<144x128xf32> to vector<144x128xbf16>
    %c0_7 = arith.constant 0 : index
    %c0_8 = arith.constant 0 : index
    %c0_9 = arith.constant 0 : index
    %17 = vector.load %arg4[%c0_7, %c0_8, %c0_9] : memref<1x144x128xbf16, #tpu.memory_space<vmem>>, vector<1x144x128xbf16>
    %18 = vector.shape_cast %17 : vector<1x144x128xbf16> to vector<144x128xbf16>
    %19 = vector.shape_cast %16 : vector<144x128xbf16> to vector<1x144x128xbf16>
    tpu.vector_store %arg4[%c0_7, %c0_8, %c0_9], %19 {strides = array<i32>} : memref<1x144x128xbf16, #tpu.memory_space<vmem>>, vector<1x144x128xbf16>,
    return
  }
  func.func @transform_0(%arg0: i32) -> (i32, i32, i32) {
    %c0_i32 = arith.constant 0 : i32
    %c0_i32_0 = arith.constant 0 : i32
    %c0_i32_1 = arith.constant 0 : i32
    return %arg0, %c0_i32, %c0_i32_0 : i32, i32, i32
  }
  func.func @transform_1(%arg0: i32) -> (i32, i32) {
    %c0_i32 = arith.constant 0 : i32
    %c0_i32_0 = arith.constant 0 : i32
    %c0_i32_1 = arith.constant 0 : i32
    return %c0_i32, %c0_i32_0 : i32, i32
  }
  func.func @transform_2(%arg0: i32) -> (i32, i32) {
    %c0_i32 = arith.constant 0 : i32
    %c0_i32_0 = arith.constant 0 : i32
    %c0_i32_1 = arith.constant 0 : i32
    return %c0_i32, %c0_i32_0 : i32, i32
  }
  func.func @transform_3(%arg0: i32) -> (i32, i32, i32) {
    %c0_i32 = arith.constant 0 : i32
    %c0_i32_0 = arith.constant 0 : i32
    %c0_i32_1 = arith.constant 0 : i32
    return %arg0, %c0_i32, %c0_i32_0 : i32, i32, i32
  }
}

module attributes {stable_mosaic.version = 11 : i64} {
  func.func @_conv_pool_kernel(%arg0: i32, %arg1: memref<1x64x500xbf16, #tpu.memory_space<vmem>>, %arg2: memref<500x128xbf16, #tpu.memory_space<vmem>>, %arg3: memref<1x128xf32, #tpu.memory_space<vmem>>, %arg4: memref<1x16x128xbf16, #tpu.memory_space<vmem>>) attributes {dimension_semantics = [#tpu.dimension_semantics<parallel>], iteration_bounds = array<i64: 2>, scalar_prefetch = 0 : i64, scratch_operands = 0 : i64, tpu.core_type = #tpu.core_type<tc>, window_params = [{transform_indices = @transform_0, window_bounds = array<i64: 1, 64, 500>}, {pipeline_mode = #tpu.pipeline_mode<synchronous>, transform_indices = @transform_1, window_bounds = array<i64: 500, 128>}, {pipeline_mode = #tpu.pipeline_mode<synchronous>, transform_indices = @transform_2, window_bounds = array<i64: 1, 128>}, {transform_indices = @transform_3, window_bounds = array<i64: 1, 16, 128>}]} {
    %c0 = arith.constant 0 : index
    %c0_0 = arith.constant 0 : index
    %c0_1 = arith.constant 0 : index
    %0 = vector.load %arg1[%c0, %c0_0, %c0_1] : memref<1x64x500xbf16, #tpu.memory_space<vmem>>, vector<1x64x500xbf16>
    %1 = vector.shape_cast %0 : vector<1x64x500xbf16> to vector<64x500xbf16>
    %c0_2 = arith.constant 0 : index
    %c0_3 = arith.constant 0 : index
    %2 = vector.load %arg2[%c0_2, %c0_3] : memref<500x128xbf16, #tpu.memory_space<vmem>>, vector<500x128xbf16>
    %cst = arith.constant dense<0.000000e+00> : vector<64x128xf32>
    %3 = tpu.matmul %1, %2, %cst {dimension_numbers = #tpu.dot_dimension_numbers<[1], [0], [0], [1], [0, 0, 1, 1], [], []>} : vector<64x500xbf16>, vector<500x128xbf16>, vector<64x128xf32> -> vector<64x128xf32>
    %c0_4 = arith.constant 0 : index
    %c0_5 = arith.constant 0 : index
    %4 = vector.load %arg3[%c0_4, %c0_5] : memref<1x128xf32, #tpu.memory_space<vmem>>, vector<1x128xf32>
    %5 = vector.broadcast %4 : vector<1x128xf32> to vector<64x128xf32>
    %6 = arith.addf %3, %5 : vector<64x128xf32>
    %cst_6 = arith.constant 0.000000e+00 : f32
    %7 = vector.broadcast %cst_6 : f32 to vector<64x128xf32>
    %8 = arith.maximumf %6, %7 : vector<64x128xf32>
    %9 = vector.extract_strided_slice %8 {offsets = [0, 0], sizes = [16, 128], strides = [1, 1]} : vector<64x128xf32> to vector<16x128xf32>
    %10 = vector.extract_strided_slice %8 {offsets = [16, 0], sizes = [16, 128], strides = [1, 1]} : vector<64x128xf32> to vector<16x128xf32>
    %11 = arith.maximumf %9, %10 : vector<16x128xf32>
    %12 = vector.extract_strided_slice %8 {offsets = [32, 0], sizes = [16, 128], strides = [1, 1]} : vector<64x128xf32> to vector<16x128xf32>
    %13 = vector.extract_strided_slice %8 {offsets = [48, 0], sizes = [16, 128], strides = [1, 1]} : vector<64x128xf32> to vector<16x128xf32>
    %14 = arith.maximumf %12, %13 : vector<16x128xf32>
    %15 = arith.maximumf %11, %14 : vector<16x128xf32>
    %16 = arith.truncf %15 : vector<16x128xf32> to vector<16x128xbf16>
    %c0_7 = arith.constant 0 : index
    %c0_8 = arith.constant 0 : index
    %c0_9 = arith.constant 0 : index
    %17 = vector.load %arg4[%c0_7, %c0_8, %c0_9] : memref<1x16x128xbf16, #tpu.memory_space<vmem>>, vector<1x16x128xbf16>
    %18 = vector.shape_cast %17 : vector<1x16x128xbf16> to vector<16x128xbf16>
    %19 = vector.shape_cast %16 : vector<16x128xbf16> to vector<1x16x128xbf16>
    tpu.vector_store %arg4[%c0_7, %c0_8, %c0_9], %19 {strides = array<i32>} : memref<1x16x128xbf16, #tpu.memory_space<vmem>>, vector<1x16x128xbf16>,
    return
  }
  func.func @transform_0(%arg0: i32) -> (i32, i32, i32) {
    %c0_i32 = arith.constant 0 : i32
    %c0_i32_0 = arith.constant 0 : i32
    %c0_i32_1 = arith.constant 0 : i32
    return %arg0, %c0_i32, %c0_i32_0 : i32, i32, i32
  }
  func.func @transform_1(%arg0: i32) -> (i32, i32) {
    %c0_i32 = arith.constant 0 : i32
    %c0_i32_0 = arith.constant 0 : i32
    %c0_i32_1 = arith.constant 0 : i32
    return %c0_i32, %c0_i32_0 : i32, i32
  }
  func.func @transform_2(%arg0: i32) -> (i32, i32) {
    %c0_i32 = arith.constant 0 : i32
    %c0_i32_0 = arith.constant 0 : i32
    %c0_i32_1 = arith.constant 0 : i32
    return %c0_i32, %c0_i32_0 : i32, i32
  }
  func.func @transform_3(%arg0: i32) -> (i32, i32, i32) {
    %c0_i32 = arith.constant 0 : i32
    %c0_i32_0 = arith.constant 0 : i32
    %c0_i32_1 = arith.constant 0 : i32
    return %arg0, %c0_i32, %c0_i32_0 : i32, i32, i32
  }
}

module attributes {stable_mosaic.version = 11 : i64} {
  func.func @_fc_kernel(%arg0: i32, %arg1: memref<2x800xbf16, #tpu.memory_space<vmem>>, %arg2: memref<800x512xbf16, #tpu.memory_space<vmem>>, %arg3: memref<1x512xf32, #tpu.memory_space<vmem>>, %arg4: memref<512x128xbf16, #tpu.memory_space<vmem>>, %arg5: memref<1x128xf32, #tpu.memory_space<vmem>>, %arg6: memref<2x128xf32, #tpu.memory_space<vmem>>) attributes {dimension_semantics = [#tpu.dimension_semantics<parallel>], iteration_bounds = array<i64: 1>, scalar_prefetch = 0 : i64, scratch_operands = 0 : i64, tpu.core_type = #tpu.core_type<tc>, window_params = [{transform_indices = @transform_0, window_bounds = array<i64: 2, 800>}, {pipeline_mode = #tpu.pipeline_mode<synchronous>, transform_indices = @transform_1, window_bounds = array<i64: 800, 512>}, {pipeline_mode = #tpu.pipeline_mode<synchronous>, transform_indices = @transform_2, window_bounds = array<i64: 1, 512>}, {pipeline_mode = #tpu.pipeline_mode<synchronous>, transform_indices = @transform_3, window_bounds = array<i64: 512, 128>}, {pipeline_mode = #tpu.pipeline_mode<synchronous>, transform_indices = @transform_4, window_bounds = array<i64: 1, 128>}, {transform_indices = @transform_5, window_bounds = array<i64: 2, 128>}]} {
    %c0 = arith.constant 0 : index
    %c0_0 = arith.constant 0 : index
    %0 = vector.load %arg1[%c0, %c0_0] : memref<2x800xbf16, #tpu.memory_space<vmem>>, vector<2x800xbf16>
    %c0_1 = arith.constant 0 : index
    %c0_2 = arith.constant 0 : index
    %1 = vector.load %arg2[%c0_1, %c0_2] : memref<800x512xbf16, #tpu.memory_space<vmem>>, vector<800x512xbf16>
    %cst = arith.constant dense<0.000000e+00> : vector<2x512xf32>
    %2 = tpu.matmul %0, %1, %cst {dimension_numbers = #tpu.dot_dimension_numbers<[1], [0], [0], [1], [0, 0, 1, 1], [], []>} : vector<2x800xbf16>, vector<800x512xbf16>, vector<2x512xf32> -> vector<2x512xf32>
    %c0_3 = arith.constant 0 : index
    %c0_4 = arith.constant 0 : index
    %3 = vector.load %arg3[%c0_3, %c0_4] : memref<1x512xf32, #tpu.memory_space<vmem>>, vector<1x512xf32>
    %4 = vector.broadcast %3 : vector<1x512xf32> to vector<2x512xf32>
    %5 = arith.addf %2, %4 : vector<2x512xf32>
    %cst_5 = arith.constant 0.000000e+00 : f32
    %6 = vector.broadcast %cst_5 : f32 to vector<2x512xf32>
    %7 = arith.maximumf %5, %6 : vector<2x512xf32>
    %8 = arith.truncf %7 : vector<2x512xf32> to vector<2x512xbf16>
    %c0_6 = arith.constant 0 : index
    %c0_7 = arith.constant 0 : index
    %9 = vector.load %arg4[%c0_6, %c0_7] : memref<512x128xbf16, #tpu.memory_space<vmem>>, vector<512x128xbf16>
    %cst_8 = arith.constant dense<0.000000e+00> : vector<2x128xf32>
    %10 = tpu.matmul %8, %9, %cst_8 {dimension_numbers = #tpu.dot_dimension_numbers<[1], [0], [0], [1], [0, 0, 1, 1], [], []>} : vector<2x512xbf16>, vector<512x128xbf16>, vector<2x128xf32> -> vector<2x128xf32>
    %c0_9 = arith.constant 0 : index
    %c0_10 = arith.constant 0 : index
    %11 = vector.load %arg5[%c0_9, %c0_10] : memref<1x128xf32, #tpu.memory_space<vmem>>, vector<1x128xf32>
    %12 = vector.broadcast %11 : vector<1x128xf32> to vector<2x128xf32>
    %13 = arith.addf %10, %12 : vector<2x128xf32>
    %cst_11 = arith.constant dense<0xFF800000> : vector<2xf32>
    %14 = vector.multi_reduction <maximumf>, %13, %cst_11 [1] : vector<2x128xf32> to vector<2xf32>
    %15 = vector.shape_cast %14 : vector<2xf32> to vector<2x1xf32>
    %16 = vector.broadcast %15 : vector<2x1xf32> to vector<2x128xf32>
    %17 = arith.subf %13, %16 : vector<2x128xf32>
    %18 = math.exp %17 : vector<2x128xf32>
    %cst_12 = arith.constant dense<0.000000e+00> : vector<2xf32>
    %19 = vector.multi_reduction <add>, %18, %cst_12 [1] : vector<2x128xf32> to vector<2xf32>
    %20 = vector.shape_cast %19 : vector<2xf32> to vector<2x1xf32>
    %21 = math.log %20 : vector<2x1xf32>
    %22 = vector.broadcast %21 : vector<2x1xf32> to vector<2x128xf32>
    %23 = arith.subf %17, %22 : vector<2x128xf32>
    %c0_13 = arith.constant 0 : index
    %c0_14 = arith.constant 0 : index
    %24 = vector.load %arg6[%c0_13, %c0_14] : memref<2x128xf32, #tpu.memory_space<vmem>>, vector<2x128xf32>
    tpu.vector_store %arg6[%c0_13, %c0_14], %23 {strides = array<i32>} : memref<2x128xf32, #tpu.memory_space<vmem>>, vector<2x128xf32>,
    return
  }
  func.func @transform_0(%arg0: i32) -> (i32, i32) {
    %c0_i32 = arith.constant 0 : i32
    %c0_i32_0 = arith.constant 0 : i32
    return %arg0, %c0_i32 : i32, i32
  }
  func.func @transform_1(%arg0: i32) -> (i32, i32) {
    %c0_i32 = arith.constant 0 : i32
    %c0_i32_0 = arith.constant 0 : i32
    %c0_i32_1 = arith.constant 0 : i32
    return %c0_i32, %c0_i32_0 : i32, i32
  }
  func.func @transform_2(%arg0: i32) -> (i32, i32) {
    %c0_i32 = arith.constant 0 : i32
    %c0_i32_0 = arith.constant 0 : i32
    %c0_i32_1 = arith.constant 0 : i32
    return %c0_i32, %c0_i32_0 : i32, i32
  }
  func.func @transform_3(%arg0: i32) -> (i32, i32) {
    %c0_i32 = arith.constant 0 : i32
    %c0_i32_0 = arith.constant 0 : i32
    %c0_i32_1 = arith.constant 0 : i32
    return %c0_i32, %c0_i32_0 : i32, i32
  }
  func.func @transform_4(%arg0: i32) -> (i32, i32) {
    %c0_i32 = arith.constant 0 : i32
    %c0_i32_0 = arith.constant 0 : i32
    %c0_i32_1 = arith.constant 0 : i32
    return %c0_i32, %c0_i32_0 : i32, i32
  }
  func.func @transform_5(%arg0: i32) -> (i32, i32) {
    %c0_i32 = arith.constant 0 : i32
    %c0_i32_0 = arith.constant 0 : i32
    return %arg0, %c0_i32 : i32, i32
  }
}

</mosaic_0001>

<bundles_post_ra>
// kernel: mnist_conv_forward.3
= control target key start
LH: loop header
LB: loop body
LE: loop exit
PB: predicated region body
PF: predicated region fallthrough
CT: control target
= control target key end

     0   :  { %s1523_s12 = smov 0   ;;  %s1901_s0 = inlined_call_operand.vmem [shape: bf16[2,576,25], index: 0, kind: input, shape index: {}]   ;;  %s1902_s1 = inlined_call_operand.vmem [shape: bf16[25,128], index: 1, kind: input, shape index: {}]   ;;  %s1903_s2 = inlined_call_operand.vmem [shape: f32[1,128], index: 2, kind: input, shape index: {}]   ;;  %s1904_s3 = inlined_call_operand.vmem [shape: bf16[2,144,128], index: 3, kind: output, shape index: {}]  }
   0x1 LB: > { %s1154_s13 = sadd.s32 4294967295, %s1500_s12   ;;  %p1158_p0 = scmp.ge.s32.totalorder %s1500_s12, 1  ;;  %s1500_s12 = sphi %s1523_s12, %s13_s12  }
   0x2   : > { %p137_p1 = scmp.lt.s32.totalorder %s1500_s12, 3 }
   0x4   : > { %p138_p2 = pnand %p1158_p0, %p137_p1 }
   0x5   : > { %v1456_v0 = vld [vmem:[%s1902_s1] sm:$0xff] (!%p138_p2)   ;;  %vm555_vm0 = vcmask (!%p138_p2), 1043456   ;;  %v1457_v1 = vld [vmem:[%s1902_s1 + $0x8] sm:$0x1f] (!%p138_p2)   ;;  %vm556_vm1 = vcmask (!%p138_p2), 1044480   ;;  %p161_p3 = scmp.lt.s32.totalorder (!%p138_p2), %s1154_s13, 1 }
   0x6   : > { %141 = sbr.rel (%p138_p2) target bundleno = 314 (0x13a), region = 32  ;;  %1365 = vmatprep.subr.bf16.mxu0 (!%p138_p2), %v1456_v0  ;;  %1441 = vmatprep.subr.bf16.mxu1 (!%p138_p2), %v1456_v0  ;;  %v1502_v2 = vmov (!%p138_p2), 65535   ;;  %vm446_vm2 = vcmask (!%p138_p2), 203776   ;;  %v1620_v61 = vld [vmem:[%s1903_s2] ss:$0 sm:$0xff] (!%p138_p2) }
   0x7   : > { %1366 = vmatpush3.bf16.msra.mxu0 (!%p138_p2), %v1456_v0  ;;  %1443 = vmatpush3.bf16.msra.mxu1 (!%p138_p2), %v1456_v0  ;;  %v557_v3 = vsel (!%p138_p2), %vm555_vm0, 4294967295, %v1502_v2 }
   0x8   : > { %v558_v4 = vsel (!%p138_p2), %vm556_vm1, %v557_v3, 0 }
   0x9   : > { %v560_v5 = vand.u32 (!%p138_p2), %v1457_v1, %v558_v4 }
   0xb   : > { %1367 = vmatprep.subr.bf16.mxu0 (!%p138_p2), %v560_v5  ;;  %1442 = vmatprep.subr.bf16.mxu1 (!%p138_p2), %v560_v5 }
   0xc   : > { %1368 = vmatpush3.bf16.msra.mxu0 (!%p138_p2), %v560_v5  ;;  %1444 = vmatpush3.bf16.msra.mxu1 (!%p138_p2), %v560_v5 }
   0xd   : > { %s1921_s13 = smov (!%p161_p3, %s1154_s13), 1 }
   0xe   : > { %s1445_s18 = smul.u32 288, %s1921_s13 }
   0xf   : > { %s1446_s24 = smul.u32 72, %s1921_s13 }
  0x10   : > { %s1543_s21 = scalar_lea.vmem %s1901_s0, %s1445_s18 }
  0x11   : > { %v1458_v6 = vld [vmem:[%s1543_s21] sm:$0xff]   ;;  %v1459_v7 = vld [vmem:[%s1543_s21 + $0x90] sm:$0xff]   ;;  %v1460_v8 = vld [vmem:[%s1543_s21 + $0x8] sm:$0xff]   ;;  %s1779_s27 = scalar_lea.vmem %s1904_s3, %s1446_s24 }
  0x12   : > { %1369 = vmatprep.mubr.msk.bf16.mxu0 %vm446_vm2, %v1458_v6  ;;  %1405 = vmatprep.mubr.msk.bf16.mxu1 %vm446_vm2, %v1459_v7  ;;  %v1461_v9 = vld [vmem:[%s1543_s21 + $0x98] sm:$0xff]   ;;  %v1462_v10 = vld [vmem:[%s1543_s21 + $0x10] sm:$0xff]   ;;  %v1463_v11 = vld [vmem:[%s1543_s21 + $0xa0] sm:$0xff]  }
  0x13   : > { %1370 = vmatmul.mubr.msk.bf16.vlgmr.msra.gmra.mrb[0].mxu0 %vm446_vm2, %v1460_v8  ;;  %1406 = vmatmul.mubr.msk.bf16.vlgmr.msra.gmra.mrb[0].mxu1 %vm446_vm2, %v1461_v9  ;;  %v1464_v12 = vld [vmem:[%s1543_s21 + $0x18] sm:$0xff]   ;;  %v1465_v13 = vld [vmem:[%s1543_s21 + $0xa8] sm:$0xff]   ;;  %v1466_v14 = vld [vmem:[%s1543_s21 + $0x20] sm:$0xff]  }
  0x14   : > { %1373 = vmatprep.mubr.msk.bf16.mxu0 %vm446_vm2, %v1462_v10  ;;  %1409 = vmatprep.mubr.msk.bf16.mxu1 %vm446_vm2, %v1463_v11  ;;  %v1467_v15 = vld [vmem:[%s1543_s21 + $0xb0] sm:$0xff]   ;;  %v1468_v16 = vld [vmem:[%s1543_s21 + $0x28] sm:$0xff]   ;;  %v1469_v17 = vld [vmem:[%s1543_s21 + $0xb8] sm:$0xff]  }
  0x15   : > { %v1470_v18 = vld [vmem:[%s1543_s21 + $0x30] sm:$0xff]   ;;  %v1471_v19 = vld [vmem:[%s1543_s21 + $0xc0] sm:$0xff]   ;;  %v1472_v20 = vld [vmem:[%s1543_s21 + $0x38] sm:$0xff]  }
  0x16   : > { %v1473_v21 = vld [vmem:[%s1543_s21 + $0xc8] sm:$0xff]   ;;  %v1474_v22 = vld [vmem:[%s1543_s21 + $0x40] sm:$0xff]   ;;  %v1475_v23 = vld [vmem:[%s1543_s21 + $0xd0] sm:$0xff]  }
  0x17   : > { %v1476_v24 = vld [vmem:[%s1543_s21 + $0x48] sm:$0xff]   ;;  %v1477_v25 = vld [vmem:[%s1543_s21 + $0xd8] sm:$0xff]   ;;  %v1478_v26 = vld [vmem:[%s1543_s21 + $0x50] sm:$0xff]  }
  0x18   : > { %v1479_v27 = vld [vmem:[%s1543_s21 + $0xe0] sm:$0xff]   ;;  %v1480_v28 = vld [vmem:[%s1543_s21 + $0x58] sm:$0xff]   ;;  %v1481_v29 = vld [vmem:[%s1543_s21 + $0xe8] sm:$0xff]  }
  0x19   : > { %v1482_v30 = vld [vmem:[%s1543_s21 + $0x60] sm:$0xff]   ;;  %v1483_v31 = vld [vmem:[%s1543_s21 + $0xf0] sm:$0xff]   ;;  %v1484_v32 = vld [vmem:[%s1543_s21 + $0x68] sm:$0xff]  }
  0x1a   : > { %v1485_v33 = vld [vmem:[%s1543_s21 + $0xf8] sm:$0xff]   ;;  %v1486_v34 = vld [vmem:[%s1543_s21 + $0x70] sm:$0xff]   ;;  %v1487_v35 = vld [vmem:[%s1543_s21 + $0x100] sm:$0xff]  }
  0x1b   : > { %1374 = vmatmul.mubr.msk.bf16.gmra.mrb[4].mxu0 %vm446_vm2, %v1464_v12  ;;  %1410 = vmatmul.mubr.msk.bf16.gmra.mrb[4].mxu1 %vm446_vm2, %v1465_v13  ;;  %v1488_v36 = vld [vmem:[%s1543_s21 + $0x78] sm:$0xff]   ;;  %v1489_v37 = vld [vmem:[%s1543_s21 + $0x108] sm:$0xff]   ;;  %v1490_v38 = vld [vmem:[%s1543_s21 + $0x80] sm:$0xff]  }
  0x1c   : > { %1377 = vmatprep.mubr.msk.bf16.mxu0 %vm446_vm2, %v1466_v14  ;;  %1413 = vmatprep.mubr.msk.bf16.mxu1 %vm446_vm2, %v1467_v15  ;;  %v1491_v39 = vld [vmem:[%s1543_s21 + $0x110] sm:$0xff]   ;;  %v1492_v40 = vld [vmem:[%s1543_s21 + $0x88] sm:$0xff]   ;;  %v1493_v41 = vld [vmem:[%s1543_s21 + $0x118] sm:$0xff]  }
  0x23   : > { %1378 = vmatmul.mubr.msk.bf16.gmra.mrb[8].mxu0 %vm446_vm2, %v1468_v16  ;;  %1414 = vmatmul.mubr.msk.bf16.gmra.mrb[8].mxu1 %vm446_vm2, %v1469_v17 }
  0x24   : > { %1381 = vmatprep.mubr.msk.bf16.mxu0 %vm446_vm2, %v1470_v18  ;;  %1417 = vmatprep.mubr.msk.bf16.mxu1 %vm446_vm2, %v1471_v19 }
  0x2b   : > { %1382 = vmatmul.mubr.msk.bf16.gmra.mrb[12].mxu0 %vm446_vm2, %v1472_v20  ;;  %1418 = vmatmul.mubr.msk.bf16.gmra.mrb[12].mxu1 %vm446_vm2, %v1473_v21 }
  0x2c   : > { %1385 = vmatprep.mubr.msk.bf16.mxu0 %vm446_vm2, %v1474_v22  ;;  %1421 = vmatprep.mubr.msk.bf16.mxu1 %vm446_vm2, %v1475_v23 }
  0x33   : > { %1386 = vmatmul.mubr.msk.bf16.gmra.mrb[16].mxu0 %vm446_vm2, %v1476_v24  ;;  %1422 = vmatmul.mubr.msk.bf16.gmra.mrb[16].mxu1 %vm446_vm2, %v1477_v25 }
  0x34   : > { %1389 = vmatprep.mubr.msk.bf16.mxu0 %vm446_vm2, %v1478_v26  ;;  %1425 = vmatprep.mubr.msk.bf16.mxu1 %vm446_vm2, %v1479_v27 }
  0x3b   : > { %1390 = vmatmul.mubr.msk.bf16.gmra.mrb[20].mxu0 %vm446_vm2, %v1480_v28  ;;  %1426 = vmatmul.mubr.msk.bf16.gmra.mrb[20].mxu1 %vm446_vm2, %v1481_v29 }
  0x3c   : > { %1393 = vmatprep.mubr.msk.bf16.mxu0 %vm446_vm2, %v1482_v30  ;;  %1429 = vmatprep.mubr.msk.bf16.mxu1 %vm446_vm2, %v1483_v31 }
  0x43   : > { %1394 = vmatmul.mubr.msk.bf16.gmra.mrb[24].mxu0 %vm446_vm2, %v1484_v32  ;;  %1430 = vmatmul.mubr.msk.bf16.gmra.mrb[24].mxu1 %vm446_vm2, %v1485_v33 }
  0x44   : > { %1397 = vmatprep.mubr.msk.bf16.mxu0 %vm446_vm2, %v1486_v34  ;;  %1433 = vmatprep.mubr.msk.bf16.mxu1 %vm446_vm2, %v1487_v35 }
  0x4b   : > { %1398 = vmatmul.mubr.msk.bf16.gmra.mrb[28].mxu0 %vm446_vm2, %v1488_v36  ;;  %1434 = vmatmul.mubr.msk.bf16.gmra.mrb[28].mxu1 %vm446_vm2, %v1489_v37 }
  0x4c   : > { %1401 = vmatprep.mubr.msk.bf16.mxu0 %vm446_vm2, %v1490_v38  ;;  %1437 = vmatprep.mubr.msk.bf16.mxu1 %vm446_vm2, %v1491_v39 }
  0x53   : > { %1402 = vmatmul.mubr.msk.bf16.gmra.mrb[32].mxu0 %vm446_vm2, %v1492_v40  ;;  %1438 = vmatmul.mubr.msk.bf16.gmra.mrb[32].mxu1 %vm446_vm2, %v1493_v41 }
  0xe6   : > { %v1371_v42 = vpop.f32.mrb[0].mxu0  ;;  %v1407_v43 = vpop.f32.mrb[0].mxu1 }
  0xe7   : > { %v596_v44 = vpop.f32.mrb[1].mxu0  ;;  %v740_v45 = vpop.f32.mrb[1].mxu1  ;;  %v1623_v3 = vadd.f32 %v1371_v42, %v1620_v61  ;;  %v1626_v4 = vadd.f32 %v1407_v43, %v1620_v61 }
  0xe8   : > { %v1372_v46 = vpop.f32.mrb[2].mxu0  ;;  %v1408_v47 = vpop.f32.mrb[2].mxu1  ;;  %v1629_v5 = vadd.f32 %v1620_v61, %v596_v44  ;;  %v1632_v6 = vadd.f32 %v1620_v61, %v740_v45 }
  0xe9   : > { %v599_v48 = vpop.f32.mrb[3].mxu0  ;;  %v743_v49 = vpop.f32.mrb[3].mxu1  ;;  %v1635_v7 = vadd.f32 %v1372_v46, %v1620_v61  ;;  %v885_v9 = vmax.f32 %v1623_v3, 0.0  ;;  %v921_v10 = vmax.f32 %v1626_v4, 0.0  ;;  %v1641_v12 = vadd.f32 %v1408_v47, %v1620_v61 }
  0xea   : > { %v883_v11 = vmax.f32 %v1629_v5, 0.0  ;;  %v919_v15 = vmax.f32 %v1632_v6, 0.0  ;;  %v1645_v16 = vadd.f32 %v1620_v61, %v599_v48  ;;  %v1648_v17 = vadd.f32 %v1620_v61, %v743_v49 }
  0xeb   : > { %v886_v27 = vmax.f32 %v1635_v7, 0.0  ;;  %v922_v32 = vmax.f32 %v1641_v12, 0.0 }
  0xec   : > { %v884_v36 = vmax.f32 %v1645_v16, 0.0  ;;  %v920_v37 = vmax.f32 %v1648_v17, 0.0 }
  0xee   : > { %v1375_v50 = vpop.f32.mrb[4].mxu0  ;;  %v1411_v51 = vpop.f32.mrb[4].mxu1 }
  0xef   : > { %v612_v52 = vpop.f32.mrb[5].mxu0  ;;  %v756_v53 = vpop.f32.mrb[5].mxu1  ;;  %v1651_v18 = vadd.f32 %v1375_v50, %v1620_v61  ;;  %v1656_v21 = vadd.f32 %v1411_v51, %v1620_v61 }
  0xf0   : > { %v1376_v54 = vpop.f32.mrb[6].mxu0  ;;  %v1412_v55 = vpop.f32.mrb[6].mxu1  ;;  %v1659_v22 = vadd.f32 %v1620_v61, %v612_v52  ;;  %v1662_v23 = vadd.f32 %v1620_v61, %v756_v53 }
  0xf1   : > { %v615_v56 = vpop.f32.mrb[7].mxu0  ;;  %v759_v57 = vpop.f32.mrb[7].mxu1  ;;  %v1665_v24 = vadd.f32 %v1376_v54, %v1620_v61  ;;  %v1671_v28 = vadd.f32 %v1412_v55, %v1620_v61 }
  0xf2   : > { %v1674_v29 = vadd.f32 %v1620_v61, %v615_v56  ;;  %v1677_v30 = vadd.f32 %v1620_v61, %v759_v57  ;;  %v887_v41 = vmax.f32 %v1659_v22, 0.0  ;;  %v923_v42 = vmax.f32 %v1662_v23, 0.0 }
  0xf4   : > { %v888_v45 = vmax.f32 %v1674_v29, 0.0  ;;  %v924_v46 = vmax.f32 %v1677_v30, 0.0 }
  0xf6   : > { %v1379_v58 = vpop.f32.mrb[8].mxu0  ;;  %v1415_v59 = vpop.f32.mrb[8].mxu1 }
  0xf7   : > { %v628_v60 = vpop.f32.mrb[9].mxu0  ;;  %v772_v62 = vpop.f32.mrb[9].mxu1  ;;  %v1683_v33 = vadd.f32 %v1379_v58, %v1620_v61  ;;  %v1686_v34 = vadd.f32 %v1415_v59, %v1620_v61 }
  0xf8   : > { %v1380_v63 = vpop.f32.mrb[10].mxu0  ;;  %v1416_v0 = vpop.f32.mrb[10].mxu1  ;;  %v1689_v35 = vadd.f32 %v1620_v61, %v628_v60  ;;  %v1695_v39 = vadd.f32 %v1620_v61, %v772_v62 }
  0xf9   : > { %v631_v1 = vpop.f32.mrb[11].mxu0  ;;  %v775_v2 = vpop.f32.mrb[11].mxu1  ;;  %v1705_v47 = vadd.f32 %v1380_v63, %v1620_v61  ;;  %v1715_v56 = vadd.f32 %v1416_v0, %v1620_v61 }
  0xfa   : > { %v891_v51 = vmax.f32 %v1689_v35, 0.0  ;;  %v927_v55 = vmax.f32 %v1695_v39, 0.0  ;;  %v1718_v57 = vadd.f32 %v1620_v61, %v631_v1  ;;  %v1724_v62 = vadd.f32 %v1620_v61, %v775_v2 }
  0xfc   : > { %v1907_v35 = vmax.f32 %v1718_v57, 0.0 }
  0xfe   : > { %v1383_v8 = vpop.f32.mrb[12].mxu0  ;;  %v1419_v13 = vpop.f32.mrb[12].mxu1 }
  0xff   : > { %v644_v14 = vpop.f32.mrb[13].mxu0  ;;  %v788_v19 = vpop.f32.mrb[13].mxu1  ;;  %v1727_v63 = vadd.f32 %v1383_v8, %v1620_v61  ;;  %v1734_v50 = vadd.f32 %v1419_v13, %v1620_v61 }
 0x100   : > { %v1653_v20 = vpop.f32.mrb[14].mxu0  ;;  %v1667_v25 = vpop.f32.mrb[14].mxu1  ;;  %v1740_v8 = vadd.f32 %v1620_v61, %v644_v14 }
 0x101   : > { %v647_v26 = vpop.f32.mrb[15].mxu0  ;;  %v1679_v31 = vpop.f32.mrb[15].mxu1 }
 0x102   : > { %v1754_v40 = vadd.f32 %v1620_v61, %v647_v26  ;;  %v1771_v5 = vadd.f32 %v1620_v61, %v1679_v31 }
 0x104   : > { %v932_v23 = vmax.f32 %v1771_v5, 0.0  ;;  %v1916_v5 = vmax.f32 %v1705_v47, 0.0 }
 0x106   : > { %v1387_v48 = vpop.f32.mrb[16].mxu0  ;;  %v1423_v53 = vpop.f32.mrb[16].mxu1 }
 0x107   : > { %v669_v52 = vadd.f32 %v1387_v48, %v1620_v61  ;;  %v1711_v54 = vpop.f32.mrb[17].mxu0  ;;  %v813_v58 = vadd.f32 %v1423_v53, %v1620_v61  ;;  %v1721_v59 = vpop.f32.mrb[17].mxu1 }
 0x108   : > { %v1388_v60 = vpop.f32.mrb[18].mxu0  ;;  %v1424_v48 = vpop.f32.mrb[18].mxu1 }
 0x109   : > { %v901_v16 = vmax.f32 %v669_v52, 0.0  ;;  %v672_v17 = vadd.f32 %v1388_v60, %v1620_v61  ;;  %v1730_v0 = vpop.f32.mrb[19].mxu0  ;;  %v937_v53 = vmax.f32 %v813_v58, 0.0  ;;  %v816_v49 = vadd.f32 %v1424_v48, %v1620_v61  ;;  %v1737_v2 = vpop.f32.mrb[19].mxu1 }
 0x10a   : > { %v1743_v52 = vadd.f32 %v1620_v61, %v788_v19  ;;  %v1835_v39 = vadd.f32 %v1620_v61, %v1730_v0  ;;  %v1909_v0 = vmax.f32 %v1665_v24, 0.0 }
 0x10b   : > { %v955_v60 = vmax.f32 %v883_v11, %v901_v16  ;;  %v902_v44 = vmax.f32 %v672_v17, 0.0  ;;  %v973_v58 = vmax.f32 %v919_v15, %v937_v53  ;;  %v938_v48 = vmax.f32 %v816_v49, 0.0 }
 0x10c   : > { %v1760_v11 = vadd.f32 %v1653_v20, %v1620_v61  ;;  %v1766_v53 = vadd.f32 %v1667_v25, %v1620_v61 }
 0x10d   : > { %v956_v19 = vmax.f32 %v884_v36, %v902_v44  ;;  %v991_v16 = vmax.f32 %v955_v60, %v973_v58  ;;  %v974_v17 = vmax.f32 %v920_v37, %v938_v48 }
 0x10e   : > { %v1391_v6 = vpop.f32.mrb[20].mxu0  ;;  %v1427_v36 = vpop.f32.mrb[20].mxu1 }
 0x10f   : > { %v685_v26 = vadd.f32 %v1391_v6, %v1620_v61  ;;  %v676_v44 = vpop.f32.mrb[21].mxu0  ;;  %v992_v20 = vmax.f32 %v956_v19, %v974_v17  ;;  %v829_v37 = vadd.f32 %v1427_v36, %v1620_v61  ;;  %v820_v58 = vpop.f32.mrb[21].mxu1 }
 0x110   : > { %v677_v60 = vadd.f32 %v1620_v61, %v676_v44  ;;  %v1392_v48 = vpop.f32.mrb[22].mxu0  ;;  %v821_v6 = vadd.f32 %v1620_v61, %v820_v58  ;;  %v1428_v19 = vpop.f32.mrb[22].mxu1 }
 0x111   : > { %v905_v25 = vmax.f32 %v685_v26, 0.0  ;;  %v688_v31 = vadd.f32 %v1392_v48, %v1620_v61  ;;  %v679_v17 = vpop.f32.mrb[23].mxu0  ;;  %v1277_v36 = vpack.c.bf16 %v992_v20, %v991_v16  ;;  %v941_v1 = vmax.f32 %v829_v37, 0.0  ;;  %v823_v15 = vpop.f32.mrb[23].mxu1 }
 0x112   : > { %v903_v44 = vmax.f32 %v677_v60, 0.0  ;;  %v832_v49 = vadd.f32 %v1428_v19, %v1620_v61  ;;  %v939_v43 = vmax.f32 %v821_v6, 0.0  ;;  %v680_v38 = vadd.f32 %v1620_v61, %v679_v17 }
 0x113   : > { %v959_v14 = vmax.f32 %v887_v41, %v905_v25  ;;  %v906_v13 = vmax.f32 %v688_v31, 0.0  ;;  %1278 = vst [vmem:[%s1779_s27] sm:$0xff] %v1277_v36   ;;  %v977_v26 = vmax.f32 %v923_v42, %v941_v1  ;;  %v824_v20 = vadd.f32 %v1620_v61, %v823_v15 }
 0x114   : > { %v957_v58 = vmax.f32 %v885_v9, %v903_v44  ;;  %v942_v16 = vmax.f32 %v832_v49, 0.0  ;;  %v1795_v37 = vadd.f32 %v1620_v61, %v1711_v54  ;;  %v975_v22 = vmax.f32 %v921_v10, %v939_v43 }
 0x115   : > { %v960_v41 = vmax.f32 %v888_v45, %v906_v13  ;;  %v904_v60 = vmax.f32 %v680_v38, 0.0  ;;  %v995_v42 = vmax.f32 %v959_v14, %v977_v26  ;;  %v940_v9 = vmax.f32 %v824_v20, 0.0 }
 0x116   : > { %v978_v3 = vmax.f32 %v924_v46, %v942_v16  ;;  %v1395_v1 = vpop.f32.mrb[24].mxu0  ;;  %v1806_v15 = vadd.f32 %v1620_v61, %v1721_v59  ;;  %v993_v54 = vmax.f32 %v957_v58, %v975_v22  ;;  %v1431_v29 = vpop.f32.mrb[24].mxu1  ;;  %v899_v59 = vmax.f32 %v1795_v37, 0.0 }
 0x117   : > { %v958_v4 = vmax.f32 %v886_v27, %v904_v60  ;;  %v701_v10 = vadd.f32 %v1395_v1, %v1620_v61  ;;  %v692_v38 = vpop.f32.mrb[25].mxu0  ;;  %v976_v45 = vmax.f32 %v922_v32, %v940_v9  ;;  %v845_v30 = vadd.f32 %v1431_v29, %v1620_v61  ;;  %v836_v13 = vpop.f32.mrb[25].mxu1 }
 0x118   : > { %v996_v43 = vmax.f32 %v960_v41, %v978_v3  ;;  %v693_v46 = vadd.f32 %v1620_v61, %v692_v38  ;;  %v1396_v14 = vpop.f32.mrb[26].mxu0  ;;  %v837_v7 = vadd.f32 %v1620_v61, %v836_v13  ;;  %v1432_v48 = vpop.f32.mrb[26].mxu1  ;;  %v1905_v20 = vmax.f32 %v1651_v18, 0.0 }
 0x119   : > { %v909_v49 = vmax.f32 %v701_v10, 0.0  ;;  %v704_v27 = vadd.f32 %v1396_v14, %v1620_v61  ;;  %v695_v25 = vpop.f32.mrb[27].mxu0  ;;  %v994_v31 = vmax.f32 %v958_v4, %v976_v45  ;;  %v945_v12 = vmax.f32 %v845_v30, 0.0  ;;  %v839_v19 = vpop.f32.mrb[27].mxu1 }
 0x11a   : > { %v1287_v6 = vpack.c.bf16 %v996_v43, %v995_v42  ;;  %v907_v32 = vmax.f32 %v693_v46, 0.0  ;;  %v943_v36 = vmax.f32 %v837_v7, 0.0  ;;  %v848_v26 = vadd.f32 %v1432_v48, %v1620_v61 }
 0x11b   : > { %v963_v17 = vmax.f32 %v891_v51, %v909_v49  ;;  %v910_v44 = vmax.f32 %v704_v27, 0.0  ;;  %v1282_v58 = vpack.c.bf16 %v994_v31, %v993_v54  ;;  %v981_v16 = vmax.f32 %v927_v55, %v945_v12 }
 0x11c   : > { %1320 = vst [vmem:[%s1779_s27 + $0x10] sm:$0xff] %v1287_v6   ;;  %v961_v22 = vmax.f32 %v1905_v20, %v907_v32  ;;  %v696_v41 = vadd.f32 %v1620_v61, %v695_v25  ;;  %v1906_v60 = vmax.f32 %v1656_v21, 0.0  ;;  %v946_v3 = vmax.f32 %v848_v26, 0.0 }
 0x11d   : > { %v964_v51 = vmax.f32 %v1907_v35, %v910_v44  ;;  %v840_v9 = vadd.f32 %v1620_v61, %v839_v19  ;;  %v935_v1 = vmax.f32 %v1806_v15, 0.0  ;;  %1319 = vst [vmem:[%s1779_s27 + $0x8] sm:$0xff] %v1282_v58   ;;  %v999_v18 = vmax.f32 %v963_v17, %v981_v16 }
 0x11e   : > { %v979_v42 = vmax.f32 %v1906_v60, %v943_v36  ;;  %v908_v55 = vmax.f32 %v696_v41, 0.0  ;;  %v1399_v54 = vpop.f32.mrb[28].mxu0  ;;  %v1908_v21 = vmax.f32 %v1724_v62, 0.0  ;;  %v1435_v38 = vpop.f32.mrb[28].mxu1  ;;  %v1843_v45 = vadd.f32 %v1620_v61, %v1737_v2 }
 0x11f   : > { %v944_v29 = vmax.f32 %v840_v9, 0.0  ;;  %v717_v57 = vadd.f32 %v1399_v54, %v1620_v61  ;;  %v708_v43 = vpop.f32.mrb[29].mxu0  ;;  %v861_v46 = vadd.f32 %v1435_v38, %v1620_v61  ;;  %v852_v14 = vpop.f32.mrb[29].mxu1  ;;  %v1910_v7 = vmax.f32 %v1671_v28, 0.0 }
 0x120   : > { %v997_v4 = vmax.f32 %v961_v22, %v979_v42  ;;  %v982_v10 = vmax.f32 %v1908_v21, %v946_v3  ;;  %v962_v30 = vmax.f32 %v1909_v0, %v908_v55  ;;  %v709_v13 = vadd.f32 %v1620_v61, %v708_v43  ;;  %v1400_v49 = vpop.f32.mrb[30].mxu0  ;;  %v1436_v6 = vpop.f32.mrb[30].mxu1 }
 0x121   : > { %v980_v27 = vmax.f32 %v1910_v7, %v944_v29  ;;  %v913_v48 = vmax.f32 %v717_v57, 0.0  ;;  %v853_v25 = vadd.f32 %v1620_v61, %v852_v14  ;;  %v711_v2 = vpop.f32.mrb[31].mxu0  ;;  %v949_v31 = vmax.f32 %v861_v46, 0.0  ;;  %v855_v19 = vpop.f32.mrb[31].mxu1 }
 0x122   : > { %v1000_v62 = vmax.f32 %v964_v51, %v982_v10  ;;  %v911_v12 = vmax.f32 %v709_v13, 0.0  ;;  %v720_v24 = vadd.f32 %v1400_v49, %v1620_v61  ;;  %v864_v32 = vadd.f32 %v1436_v6, %v1620_v61 }
 0x123   : > { %v998_v36 = vmax.f32 %v962_v30, %v980_v27  ;;  %v1911_v44 = vmax.f32 %v1740_v8, 0.0  ;;  %v947_v28 = vmax.f32 %v853_v25, 0.0  ;;  %v1912_v58 = vmax.f32 %v1743_v52, 0.0 }
 0x124   : > { %v1297_v17 = vpack.c.bf16 %v1000_v62, %v999_v18  ;;  %v1913_v20 = vmax.f32 %v1683_v33, 0.0  ;;  %v914_v41 = vmax.f32 %v720_v24, 0.0  ;;  %v950_v60 = vmax.f32 %v864_v32, 0.0 }
 0x125   : > { %v967_v26 = vmax.f32 %v1911_v44, %v913_v48  ;;  %v985_v16 = vmax.f32 %v1912_v58, %v949_v31  ;;  %v1292_v42 = vpack.c.bf16 %v998_v36, %v997_v4  ;;  %v1914_v35 = vmax.f32 %v1686_v34, 0.0 }
 0x126   : > { %v965_v22 = vmax.f32 %v1913_v20, %v911_v12  ;;  %1322 = vst [vmem:[%s1779_s27 + $0x20] sm:$0xff] %v1297_v17   ;;  %v712_v3 = vadd.f32 %v1620_v61, %v711_v2  ;;  %v856_v8 = vadd.f32 %v1620_v61, %v855_v19  ;;  %v900_v9 = vmax.f32 %v1835_v39, 0.0  ;;  %v1403_v54 = vpop.f32.mrb[32].mxu0  ;;  %v1439_v29 = vpop.f32.mrb[32].mxu1 }
 0x127   : > { %v983_v51 = vmax.f32 %v1914_v35, %v947_v28  ;;  %v1003_v18 = vmax.f32 %v967_v26, %v985_v16  ;;  %v1915_v52 = vmax.f32 %v1754_v40, 0.0  ;;  %v986_v33 = vmax.f32 %v932_v23, %v950_v60  ;;  %1321 = vst [vmem:[%s1779_s27 + $0x18] sm:$0xff] %v1292_v42   ;;  %v724_v57 = vpop.f32.mrb[33].mxu0  ;;  %v868_v0 = vpop.f32.mrb[33].mxu1 }
 0x128   : > { %v912_v4 = vmax.f32 %v712_v3, 0.0  ;;  %v948_v10 = vmax.f32 %v856_v8, 0.0  ;;  %v733_v34 = vadd.f32 %v1403_v54, %v1620_v61  ;;  %v936_v38 = vmax.f32 %v1843_v45, 0.0  ;;  %v1404_v30 = vpop.f32.mrb[34].mxu0  ;;  %v1440_v62 = vpop.f32.mrb[34].mxu1 }
 0x129   : > { %v968_v55 = vmax.f32 %v1915_v52, %v914_v41  ;;  %v1001_v21 = vmax.f32 %v965_v22, %v983_v51  ;;  %v877_v39 = vadd.f32 %v1439_v29, %v1620_v61  ;;  %v725_v40 = vadd.f32 %v1620_v61, %v724_v57  ;;  %v727_v7 = vpop.f32.mrb[35].mxu0  ;;  %v871_v6 = vpop.f32.mrb[35].mxu1 }
 0x12a   : > { %v966_v23 = vmax.f32 %v1916_v5, %v912_v4  ;;  %v1917_v46 = vmax.f32 %v1715_v56, 0.0  ;;  %v917_v14 = vmax.f32 %v733_v34, 0.0  ;;  %v869_v49 = vadd.f32 %v1620_v61, %v868_v0 }
 0x12b   : > { %v1004_v43 = vmax.f32 %v968_v55, %v986_v33  ;;  %v953_v27 = vmax.f32 %v877_v39, 0.0  ;;  %v915_v48 = vmax.f32 %v725_v40, 0.0  ;;  %v736_v25 = vadd.f32 %v1404_v30, %v1620_v61 }
 0x12c   : > { %v984_v13 = vmax.f32 %v1917_v46, %v948_v10  ;;  %v971_v47 = vmax.f32 %v899_v59, %v917_v14  ;;  %v951_v31 = vmax.f32 %v869_v49, 0.0  ;;  %v880_v56 = vadd.f32 %v1440_v62, %v1620_v61 }
 0x12d   : > { %v1307_v45 = vpack.c.bf16 %v1004_v43, %v1003_v18  ;;  %v989_v12 = vmax.f32 %v935_v1, %v953_v27  ;;  %v1918_v24 = vmax.f32 %v1727_v63, 0.0  ;;  %v918_v19 = vmax.f32 %v736_v25, 0.0 }
 0x12e   : > { %v1002_v2 = vmax.f32 %v966_v23, %v984_v13  ;;  %v728_v17 = vadd.f32 %v1620_v61, %v727_v7  ;;  %v1919_v44 = vmax.f32 %v1734_v50, 0.0  ;;  %v954_v37 = vmax.f32 %v880_v56, 0.0 }
 0x12f   : > { %1324 = vst [vmem:[%s1779_s27 + $0x30] sm:$0xff] %v1307_v45   ;;  %v969_v32 = vmax.f32 %v1918_v24, %v915_v48  ;;  %v872_v59 = vadd.f32 %v1620_v61, %v871_v6  ;;  %v898_v28 = vmax.f32 %v1760_v11, 0.0  ;;  %v1007_v58 = vmax.f32 %v971_v47, %v989_v12 }
 0x130   : > { %v1302_v36 = vpack.c.bf16 %v1002_v2, %v1001_v21  ;;  %v987_v26 = vmax.f32 %v1919_v44, %v951_v31  ;;  %v972_v15 = vmax.f32 %v900_v9, %v918_v19  ;;  %v916_v1 = vmax.f32 %v728_v17, 0.0 }
 0x131   : > { %v934_v63 = vmax.f32 %v1766_v53, 0.0  ;;  %v990_v20 = vmax.f32 %v936_v38, %v954_v37  ;;  %v952_v22 = vmax.f32 %v872_v59, 0.0 }
 0x132   : > { %1323 = vst [vmem:[%s1779_s27 + $0x28] sm:$0xff] %v1302_v36   ;;  %v1005_v16 = vmax.f32 %v969_v32, %v987_v26  ;;  %v970_v41 = vmax.f32 %v898_v28, %v916_v1 }
 0x133   : > { %v1008_v60 = vmax.f32 %v972_v15, %v990_v20  ;;  %v988_v50 = vmax.f32 %v934_v63, %v952_v22 }
 0x135   : > { %v1317_v42 = vpack.c.bf16 %v1008_v60, %v1007_v58  ;;  %v1006_v35 = vmax.f32 %v970_v41, %v988_v50 }
 0x137   : > { %1326 = vst [vmem:[%s1779_s27 + $0x40] sm:$0xff] %v1317_v42   ;;  %v1312_v51 = vpack.c.bf16 %v1006_v35, %v1005_v16 }
 0x139   : > { %1325 = vst [vmem:[%s1779_s27 + $0x38] sm:$0xff] %v1312_v51  }
 0x13a PF: > { %s13_s12 = sadd.s32 1, %s1500_s12  }
 0x13b   : > { %p10_p4 = scmp.ge.s32.totalorder %s13_s12, 4  }
 0x13d   :  { %12 = sbr.rel (!%p10_p4) target bundleno = 1 (0x1), region = 62 }

// kernel: mnist_conv_forward.4
= control target key start
LH: loop header
LB: loop body
LE: loop exit
PB: predicated region body
PF: predicated region fallthrough
CT: control target
= control target key end

     0   :  { %s997_s12 = smov 0   ;;  %s1153_s0 = inlined_call_operand.vmem [shape: bf16[2,64,500], index: 0, kind: input, shape index: {}]   ;;  %s1154_s1 = inlined_call_operand.vmem [shape: bf16[500,128], index: 1, kind: input, shape index: {}]   ;;  %s1155_s2 = inlined_call_operand.vmem [shape: f32[1,128], index: 2, kind: input, shape index: {}]   ;;  %s1156_s3 = inlined_call_operand.vmem [shape: bf16[2,16,128], index: 3, kind: output, shape index: {}]  }
   0x1 LB: > { %s749_s13 = sadd.s32 4294967295, %s975_s12   ;;  %p753_p0 = scmp.ge.s32.totalorder %s975_s12, 1  ;;  %s975_s12 = sphi %s997_s12, %s13_s12  }
   0x2   : > { %p137_p1 = scmp.lt.s32.totalorder %s975_s12, 3 }
   0x4   : > { %p138_p2 = pnand %p753_p0, %p137_p1 }
   0x5   : > { %v913_v0 = vld [vmem:[%s1154_s1 + $0x40] sm:$0xff] (!%p138_p2)   ;;  %v917_v4 = vld [vmem:[%s1154_s1 + $0x48] sm:$0xff] (!%p138_p2)   ;;  %v921_v8 = vld [vmem:[%s1154_s1 + $0x50] sm:$0xff] (!%p138_p2)   ;;  %p161_p3 = scmp.lt.s32.totalorder (!%p138_p2), %s749_s13, 1  ;;  %vm536_vm0 = vcmask (!%p138_p2), 1041408   ;;  %vm523_vm1 = vcmask (!%p138_p2), 949248  }
   0x6   : > { %141 = sbr.rel (%p138_p2) target bundleno = 293 (0x125), region = 32  ;;  %v914_v1 = vld [vmem:[%s1154_s1 + $0xc0] sm:$0xff] (!%p138_p2)   ;;  %824 = vmatprep.subr.bf16.mxu0 (!%p138_p2), %v913_v0  ;;  %v918_v5 = vld [vmem:[%s1154_s1 + $0xc8] sm:$0xff] (!%p138_p2)   ;;  %v922_v9 = vld [vmem:[%s1154_s1 + $0xd0] sm:$0xff] (!%p138_p2)  }
   0x7   : > { %v915_v2 = vld [vmem:[%s1154_s1] sm:$0xff] (!%p138_p2)   ;;  %864 = vmatprep.subr.bf16.mxu1 (!%p138_p2), %v914_v1  ;;  %v919_v6 = vld [vmem:[%s1154_s1 + $0x8] sm:$0xff] (!%p138_p2)   ;;  %v923_v10 = vld [vmem:[%s1154_s1 + $0x10] sm:$0xff] (!%p138_p2)  }
   0x8   : > { %v916_v3 = vld [vmem:[%s1154_s1 + $0x80] sm:$0xff] (!%p138_p2)   ;;  %825 = vmatpush3.bf16.msra.mxu0 (!%p138_p2), %v915_v2  ;;  %v920_v7 = vld [vmem:[%s1154_s1 + $0x88] sm:$0xff] (!%p138_p2)   ;;  %v924_v11 = vld [vmem:[%s1154_s1 + $0x90] sm:$0xff] (!%p138_p2)  }
   0x9   : > { %865 = vmatpush3.bf16.msra.mxu1 (!%p138_p2), %v916_v3  ;;  %826 = vmatprep.subr.bf16.mxu0 (!%p138_p2), %v917_v4  ;;  %v925_v12 = vld [vmem:[%s1154_s1 + $0x58] sm:$0xff] (!%p138_p2)   ;;  %v929_v16 = vld [vmem:[%s1154_s1 + $0x60] sm:$0xff] (!%p138_p2)   ;;  %v933_v20 = vld [vmem:[%s1154_s1 + $0x68] sm:$0xff] (!%p138_p2)  }
   0xa   : > { %866 = vmatprep.subr.bf16.mxu1 (!%p138_p2), %v918_v5  ;;  %v926_v13 = vld [vmem:[%s1154_s1 + $0xd8] sm:$0xff] (!%p138_p2)   ;;  %v930_v17 = vld [vmem:[%s1154_s1 + $0xe0] sm:$0xff] (!%p138_p2)   ;;  %v934_v21 = vld [vmem:[%s1154_s1 + $0xe8] sm:$0xff] (!%p138_p2)  }
   0xb   : > { %v927_v14 = vld [vmem:[%s1154_s1 + $0x18] sm:$0xff] (!%p138_p2)   ;;  %v931_v18 = vld [vmem:[%s1154_s1 + $0x20] sm:$0xff] (!%p138_p2)   ;;  %v935_v22 = vld [vmem:[%s1154_s1 + $0x28] sm:$0xff] (!%p138_p2)  }
   0xc   : > { %827 = vmatpush3.bf16.msra.mxu0 (!%p138_p2), %v919_v6  ;;  %v928_v15 = vld [vmem:[%s1154_s1 + $0x98] sm:$0xff] (!%p138_p2)   ;;  %v932_v19 = vld [vmem:[%s1154_s1 + $0xa0] sm:$0xff] (!%p138_p2)   ;;  %v936_v23 = vld [vmem:[%s1154_s1 + $0xa8] sm:$0xff] (!%p138_p2)  }
   0xd   : > { %867 = vmatpush3.bf16.msra.mxu1 %v920_v7  ;;  %828 = vmatprep.subr.bf16.mxu0 %v921_v8  ;;  %s1158_s13 = smov (!%p161_p3, %s749_s13), 1  ;;  %v937_v24 = vld [vmem:[%s1154_s1 + $0x70] sm:$0xff]   ;;  %v941_v28 = vld [vmem:[%s1154_s1 + $0x78] sm:$0xff]   ;;  %v1136_v49 = vld [vmem:[%s1155_s2] ss:$0 sm:$0xff] }
   0xe   : > { %868 = vmatprep.subr.bf16.mxu1 %v922_v9  ;;  %v938_v25 = vld [vmem:[%s1154_s1 + $0xf0] sm:$0xff]   ;;  %s815_s18 = sshll.u32 %s1158_s13, 7  ;;  %v942_v29 = vld [vmem:[%s1154_s1 + $0xf8] ss:$0 sps:$4 sm:$0x33]   ;;  %s816_s7 = sshll.u32 %s1158_s13, 3 }
   0xf   : > { %v939_v26 = vld [vmem:[%s1154_s1 + $0x30] sm:$0xff]   ;;  %v943_v30 = vld [vmem:[%s1154_s1 + $0x38] sm:$0xff]   ;;  %s1108_s29 = scalar_lea.vmem %s1153_s0, %s815_s18  ;;  %s170_s10 = scalar_lea.vmem %s1156_s3, %s816_s7 }
  0x10   : > { %829 = vmatpush3.bf16.msra.mxu0 %v923_v10  ;;  %v940_v27 = vld [vmem:[%s1154_s1 + $0xb0] sm:$0xff]   ;;  %v944_v31 = vld [vmem:[%s1154_s1 + $0xb8] sm:$0xff]  }
  0x11   : > { %869 = vmatpush3.bf16.msra.mxu1 %v924_v11  ;;  %830 = vmatprep.subr.bf16.mxu0 %v925_v12  ;;  %v945_v32 = vld [vmem:[%s1108_s29] ss:$16 sps:$4 sm:$0xff]   ;;  %v947_v33 = vld [vmem:[%s1108_s29 + $0x4] ss:$16 sps:$4 sm:$0xff]   ;;  %v948_v34 = vld [vmem:[%s1108_s29 + $0x8] ss:$16 sps:$4 sm:$0xff]  }
  0x12   : > { %870 = vmatprep.subr.bf16.mxu1 %v926_v13  ;;  %572 = vmatprep.mubr.bf16.mxu0 %v947_v33  ;;  %v950_v35 = vld [vmem:[%s1108_s29 + $0xc] ss:$16 sps:$4 sm:$0xff]   ;;  %v951_v36 = vld [vmem:[%s1108_s29 + $0x24] ss:$16 sps:$4 sm:$0xff]   ;;  %v955_v38 = vld [vmem:[%s1108_s29 + $0x20] ss:$16 sps:$4 sm:$0xff]  }
  0x13   : > { %807 = vmatprep.mubr.msk.bf16.mxu1 %vm523_vm1, %v950_v35  ;;  %v953_v37 = vld [vmem:[%s1108_s29 + $0x2c] ss:$16 sps:$4 sm:$0xff]   ;;  %v957_v39 = vld [vmem:[%s1108_s29 + $0x44] ss:$16 sps:$4 sm:$0xff]   ;;  %v956_v40 = vld [vmem:[%s1108_s29 + $0x28] ss:$16 sps:$4 sm:$0xff]  }
  0x14   : > { %831 = vmatpush3.bf16.msra.mxu0 %v927_v14  ;;  %v959_v41 = vld [vmem:[%s1108_s29 + $0x4c] ss:$16 sps:$4 sm:$0xff]   ;;  %v961_v42 = vld [vmem:[%s1108_s29 + $0x40] ss:$16 sps:$4 sm:$0xff]   ;;  %v963_v43 = vld [vmem:[%s1108_s29 + $0x64] ss:$16 sps:$4 sm:$0xff]  }
  0x15   : > { %871 = vmatpush3.bf16.msra.mxu1 %v928_v15  ;;  %832 = vmatprep.subr.bf16.mxu0 %v929_v16  ;;  %v962_v44 = vld [vmem:[%s1108_s29 + $0x48] ss:$16 sps:$4 sm:$0xff]   ;;  %v965_v45 = vld [vmem:[%s1108_s29 + $0x6c] ss:$16 sps:$4 sm:$0xff]   ;;  %v967_v46 = vld [vmem:[%s1108_s29 + $0x60] ss:$16 sps:$4 sm:$0xff]  }
  0x16   : > { %872 = vmatprep.subr.bf16.mxu1 %v930_v17  ;;  %v968_v47 = vld [vmem:[%s1108_s29 + $0x68] ss:$16 sps:$4 sm:$0xff]  }
  0x18   : > { %833 = vmatpush3.bf16.msra.mxu0 %v931_v18 }
  0x19   : > { %873 = vmatpush3.bf16.msra.mxu1 %v932_v19  ;;  %834 = vmatprep.subr.bf16.mxu0 %v933_v20 }
  0x1a   : > { %874 = vmatprep.subr.bf16.mxu1 %v934_v21 }
  0x1c   : > { %835 = vmatpush3.bf16.msra.mxu0 %v935_v22 }
  0x1d   : > { %875 = vmatpush3.bf16.msra.mxu1 %v936_v23  ;;  %836 = vmatprep.subr.bf16.mxu0 %v937_v24 }
  0x1e   : > { %876 = vmatprep.subr.bf16.mxu1 %v938_v25 }
  0x20   : > { %837 = vmatpush3.bf16.msra.mxu0 %v939_v26 }
  0x21   : > { %877 = vmatpush3.bf16.msra.mxu1 %v940_v27  ;;  %838 = vmatprep.subr.bf16.mxu0 %v941_v28 }
  0x22   : > { %904 = vmatprep.subr.msk.bf16.mxu1 %vm536_vm0, %v942_v29 }
  0x24   : > { %839 = vmatpush3.bf16.msra.mxu0 %v943_v30 }
  0x25   : > { %879 = vmatpush3.bf16.msra.mxu1 %v944_v31 }
  0x27   : > { %573 = vmatmul.mubr.bf16.vlgmr.msra.gmra.mrb[0].mxu0 %v945_v32 }
  0x28   : > { %638 = vmatmul.mubr.bf16.vlgmr.msra.gmra.mrb[0].mxu1 %v948_v34  ;;  %580 = vmatprep.mubr.bf16.mxu0 %v951_v36 }
  0x29   : > { %808 = vmatprep.mubr.msk.bf16.mxu1 %vm523_vm1, %v953_v37 }
  0x2f   : > { %581 = vmatmul.mubr.bf16.gmra.mrb[4].mxu0 %v955_v38 }
  0x30   : > { %588 = vmatprep.mubr.bf16.mxu0 %v957_v39  ;;  %646 = vmatmul.mubr.bf16.gmra.mrb[4].mxu1 %v956_v40 }
  0x31   : > { %809 = vmatprep.mubr.msk.bf16.mxu1 %vm523_vm1, %v959_v41 }
  0x37   : > { %589 = vmatmul.mubr.bf16.gmra.mrb[8].mxu0 %v961_v42 }
  0x38   : > { %596 = vmatprep.mubr.bf16.mxu0 %v963_v43  ;;  %654 = vmatmul.mubr.bf16.gmra.mrb[8].mxu1 %v962_v44 }
  0x39   : > { %810 = vmatprep.mubr.msk.bf16.mxu1 %vm523_vm1, %v965_v45 }
  0x3f   : > { %597 = vmatmul.mubr.bf16.gmra.mrb[12].mxu0 %v967_v46 }
  0x40   : > { %662 = vmatmul.mubr.bf16.gmra.mrb[12].mxu1 %v968_v47 }
  0xfa   : > { %v840_v48 = vpop.f32.mrb[0].mxu0 }
  0xfb   : > { %v841_v50 = vpop.f32.mrb[1].mxu0  ;;  %v880_v51 = vpop.f32.mrb[0].mxu1 }
  0xfc   : > { %v842_v52 = vadd.f32 %v841_v50, %v840_v48  ;;  %v843_v53 = vpop.f32.mrb[2].mxu0  ;;  %v881_v54 = vpop.f32.mrb[1].mxu1 }
  0xfd   : > { %v844_v55 = vpop.f32.mrb[3].mxu0  ;;  %v882_v57 = vadd.f32 %v881_v54, %v880_v51  ;;  %v883_v58 = vpop.f32.mrb[2].mxu1 }
  0xfe   : > { %v575_v56 = vadd.f32 %v842_v52, %v1136_v49  ;;  %v845_v59 = vadd.f32 %v844_v55, %v843_v53  ;;  %v884_v60 = vpop.f32.mrb[3].mxu1 }
  0xff   : > { %v885_v63 = vadd.f32 %v884_v60, %v883_v58 }
 0x100   : > { %v640_v61 = vadd.f32 %v882_v57, %v575_v56  ;;  %v578_v62 = vadd.f32 %v845_v59, %v1136_v49 }
 0x102   : > { %v643_v0 = vadd.f32 %v885_v63, %v578_v62  ;;  %v846_v1 = vpop.f32.mrb[4].mxu0  ;;  %v670_v16 = vmax.f32 %v640_v61, 0.0 }
 0x103   : > { %v847_v2 = vpop.f32.mrb[5].mxu0  ;;  %v886_v3 = vpop.f32.mrb[4].mxu1 }
 0x104   : > { %v848_v4 = vadd.f32 %v847_v2, %v846_v1  ;;  %v849_v5 = vpop.f32.mrb[6].mxu0  ;;  %v887_v6 = vpop.f32.mrb[5].mxu1  ;;  %v671_v21 = vmax.f32 %v643_v0, 0.0 }
 0x105   : > { %v850_v7 = vpop.f32.mrb[7].mxu0  ;;  %v888_v9 = vadd.f32 %v887_v6, %v886_v3  ;;  %v889_v10 = vpop.f32.mrb[6].mxu1 }
 0x106   : > { %v583_v8 = vadd.f32 %v848_v4, %v1136_v49  ;;  %v851_v11 = vadd.f32 %v850_v7, %v849_v5  ;;  %v890_v12 = vpop.f32.mrb[7].mxu1 }
 0x107   : > { %v891_v15 = vadd.f32 %v890_v12, %v889_v10 }
 0x108   : > { %v648_v13 = vadd.f32 %v888_v9, %v583_v8  ;;  %v586_v14 = vadd.f32 %v851_v11, %v1136_v49 }
 0x10a   : > { %v672_v17 = vmax.f32 %v648_v13, 0.0  ;;  %v651_v18 = vadd.f32 %v891_v15, %v586_v14  ;;  %v852_v19 = vpop.f32.mrb[8].mxu0 }
 0x10b   : > { %v853_v20 = vpop.f32.mrb[9].mxu0  ;;  %v892_v24 = vpop.f32.mrb[8].mxu1 }
 0x10c   : > { %v678_v22 = vmax.f32 %v670_v16, %v672_v17  ;;  %v673_v23 = vmax.f32 %v651_v18, 0.0  ;;  %v854_v25 = vadd.f32 %v853_v20, %v852_v19  ;;  %v855_v26 = vpop.f32.mrb[10].mxu0  ;;  %v893_v27 = vpop.f32.mrb[9].mxu1 }
 0x10d   : > { %v856_v28 = vpop.f32.mrb[11].mxu0  ;;  %v894_v31 = vadd.f32 %v893_v27, %v892_v24  ;;  %v895_v32 = vpop.f32.mrb[10].mxu1 }
 0x10e   : > { %v679_v29 = vmax.f32 %v671_v21, %v673_v23  ;;  %v591_v30 = vadd.f32 %v854_v25, %v1136_v49  ;;  %v857_v33 = vadd.f32 %v856_v28, %v855_v26  ;;  %v896_v34 = vpop.f32.mrb[11].mxu1 }
 0x10f   : > { %v897_v37 = vadd.f32 %v896_v34, %v895_v32 }
 0x110   : > { %v656_v35 = vadd.f32 %v894_v31, %v591_v30  ;;  %v594_v36 = vadd.f32 %v857_v33, %v1136_v49 }
 0x112   : > { %v659_v38 = vadd.f32 %v897_v37, %v594_v36  ;;  %v858_v39 = vpop.f32.mrb[12].mxu0  ;;  %v674_v55 = vmax.f32 %v656_v35, 0.0 }
 0x113   : > { %v859_v40 = vpop.f32.mrb[13].mxu0  ;;  %v898_v41 = vpop.f32.mrb[12].mxu1 }
 0x114   : > { %v860_v42 = vadd.f32 %v859_v40, %v858_v39  ;;  %v861_v43 = vpop.f32.mrb[14].mxu0  ;;  %v899_v44 = vpop.f32.mrb[13].mxu1  ;;  %v675_v58 = vmax.f32 %v659_v38, 0.0 }
 0x115   : > { %v862_v45 = vpop.f32.mrb[15].mxu0  ;;  %v900_v47 = vadd.f32 %v899_v44, %v898_v41  ;;  %v901_v48 = vpop.f32.mrb[14].mxu1 }
 0x116   : > { %v599_v46 = vadd.f32 %v860_v42, %v1136_v49  ;;  %v863_v50 = vadd.f32 %v862_v45, %v861_v43  ;;  %v902_v51 = vpop.f32.mrb[15].mxu1 }
 0x117   : > { %v903_v54 = vadd.f32 %v902_v51, %v901_v48 }
 0x118   : > { %v664_v52 = vadd.f32 %v900_v47, %v599_v46  ;;  %v602_v53 = vadd.f32 %v863_v50, %v1136_v49 }
 0x11a   : > { %v676_v56 = vmax.f32 %v664_v52, 0.0  ;;  %v667_v57 = vadd.f32 %v903_v54, %v602_v53 }
 0x11c   : > { %v680_v59 = vmax.f32 %v674_v55, %v676_v56  ;;  %v677_v60 = vmax.f32 %v667_v57, 0.0 }
 0x11e   : > { %v682_v61 = vmax.f32 %v678_v22, %v680_v59  ;;  %v681_v62 = vmax.f32 %v675_v58, %v677_v60 }
 0x120   : > { %v683_v63 = vmax.f32 %v679_v29, %v681_v62 }
 0x122   : > { %v822_v0 = vpack.c.bf16 %v683_v63, %v682_v61 }
 0x124   : > { %823 = vst [vmem:[%s170_s10] sm:$0xff] %v822_v0  }
 0x125 PF: > { %s13_s12 = sadd.s32 1, %s975_s12  }
 0x126   : > { %p10_p4 = scmp.ge.s32.totalorder %s13_s12, 4  }
 0x128   :  { %12 = sbr.rel (!%p10_p4) target bundleno = 1 (0x1), region = 62 }

// kernel: mnist_conv_forward.5
= control target key start
LH: loop header
LB: loop body
LE: loop exit
PB: predicated region body
PF: predicated region fallthrough
CT: control target
= control target key end

     0   :  { %v225_v36 = vlaneseq  ;;  %v2682_v37 = vmov 1966171168   ;;  %s3455_s0 = inlined_call_operand.vmem [shape: bf16[2,800], index: 0, kind: input, shape index: {}]   ;;  %s3456_s1 = inlined_call_operand.vmem [shape: bf16[800,512], index: 1, kind: input, shape index: {}]   ;;  %s3457_s2 = inlined_call_operand.vmem [shape: f32[1,512], index: 2, kind: input, shape index: {}]   ;;  %s3458_s3 = inlined_call_operand.vmem [shape: bf16[512,128], index: 3, kind: input, shape index: {}]   ;;  %s3459_s4 = inlined_call_operand.vmem [shape: f32[1,128], index: 4, kind: input, shape index: {}]   ;;  %s3460_s5 = inlined_call_operand.hbm [shape: f32[2,128], index: 5, kind: output, shape index: {}]  }
   0x1   :  { %v2321_v0 = vld [vmem:[%s3456_s1 + $0x4] ss:$16 sps:$4 sm:$0xff]   ;;  %v2323_v1 = vld [vmem:[%s3456_s1 + $0xc] ss:$16 sps:$4 sm:$0xff]   ;;  %v2325_v2 = vld [vmem:[%s3456_s1] ss:$16 sps:$4 sm:$0xff]   ;;  %v248_v38 = vunpack.c.l.s4 %v2682_v37 }
   0x2   :  { %1304 = vmatprep.subr.bf16.mxu0 %v2321_v0  ;;  %v2326_v3 = vld [vmem:[%s3456_s1 + $0x8] ss:$16 sps:$4 sm:$0xff]   ;;  %1468 = vmatprep.subr.bf16.mxu1 %v2323_v1  ;;  %v2327_v4 = vld [vmem:[%s3456_s1 + $0x24] ss:$16 sps:$4 sm:$0xff]   ;;  %v2329_v5 = vld [vmem:[%s3456_s1 + $0x2c] ss:$16 sps:$4 sm:$0xff]  }
   0x3   :  { %1305 = vmatpush1.bf16.msra.mxu0 %v2325_v2  ;;  %1469 = vmatpush1.bf16.msra.mxu1 %v2326_v3  ;;  %v2331_v6 = vld [vmem:[%s3456_s1 + $0x20] ss:$16 sps:$4 sm:$0xff]   ;;  %v2332_v7 = vld [vmem:[%s3456_s1 + $0x28] ss:$16 sps:$4 sm:$0xff]   ;;  %v2333_v8 = vld [vmem:[%s3456_s1 + $0x44] ss:$16 sps:$4 sm:$0xff]   ;;  %v249_v43 = vunpack.c.0.s8 %v248_v38 }
   0x4   :  { %1306 = vmatprep.subr.bf16.mxu0 %v2327_v4  ;;  %1470 = vmatprep.subr.bf16.mxu1 %v2329_v5  ;;  %v2335_v9 = vld [vmem:[%s3456_s1 + $0x4c] ss:$16 sps:$4 sm:$0xff]   ;;  %v2337_v10 = vld [vmem:[%s3456_s1 + $0x40] ss:$16 sps:$4 sm:$0xff]   ;;  %v2338_v11 = vld [vmem:[%s3456_s1 + $0x48] ss:$16 sps:$4 sm:$0xff]  }
   0x5   :  { %v2339_v12 = vld [vmem:[%s3456_s1 + $0x64] ss:$16 sps:$4 sm:$0xff]   ;;  %v2341_v13 = vld [vmem:[%s3456_s1 + $0x6c] ss:$16 sps:$4 sm:$0xff]   ;;  %v2343_v14 = vld [vmem:[%s3456_s1 + $0x60] ss:$16 sps:$4 sm:$0xff]  }
   0x6   :  { %v2344_v15 = vld [vmem:[%s3456_s1 + $0x68] ss:$16 sps:$4 sm:$0xff]   ;;  %v2345_v16 = vld [vmem:[%s3456_s1 + $0x84] ss:$16 sps:$4 sm:$0xff]   ;;  %v2347_v17 = vld [vmem:[%s3456_s1 + $0x8c] ss:$16 sps:$4 sm:$0xff]  }
   0x7   :  { %1307 = vmatpush1.bf16.msra.mxu0 %v2331_v6  ;;  %1471 = vmatpush1.bf16.msra.mxu1 %v2332_v7  ;;  %v2349_v18 = vld [vmem:[%s3456_s1 + $0x80] ss:$16 sps:$4 sm:$0xff]   ;;  %v2350_v19 = vld [vmem:[%s3456_s1 + $0x88] ss:$16 sps:$4 sm:$0xff]   ;;  %v2351_v20 = vld [vmem:[%s3456_s1 + $0xa4] ss:$16 sps:$4 sm:$0xff]  }
   0x8   :  { %1308 = vmatprep.subr.bf16.mxu0 %v2333_v8  ;;  %1472 = vmatprep.subr.bf16.mxu1 %v2335_v9  ;;  %v2353_v21 = vld [vmem:[%s3456_s1 + $0xac] ss:$16 sps:$4 sm:$0xff]   ;;  %v2355_v22 = vld [vmem:[%s3456_s1 + $0xa0] ss:$16 sps:$4 sm:$0xff]   ;;  %v2356_v23 = vld [vmem:[%s3456_s1 + $0xa8] ss:$16 sps:$4 sm:$0xff]  }
   0x9   :  { %v2357_v24 = vld [vmem:[%s3456_s1 + $0xc4] ss:$16 sps:$4 sm:$0xff]   ;;  %v2359_v25 = vld [vmem:[%s3456_s1 + $0xcc] ss:$16 sps:$4 sm:$0xff]   ;;  %v2361_v26 = vld [vmem:[%s3456_s1 + $0xc0] ss:$16 sps:$4 sm:$0xff]  }
   0xa   :  { %v2362_v27 = vld [vmem:[%s3456_s1 + $0xc8] ss:$16 sps:$4 sm:$0xff]   ;;  %v2363_v28 = vld [vmem:[%s3456_s1 + $0xe4] ss:$16 sps:$4 sm:$0xff]   ;;  %v2365_v29 = vld [vmem:[%s3456_s1 + $0xec] ss:$16 sps:$4 sm:$0xff]  }
   0xb   :  { %1309 = vmatpush1.bf16.msra.mxu0 %v2337_v10  ;;  %1473 = vmatpush1.bf16.msra.mxu1 %v2338_v11  ;;  %v2367_v30 = vld [vmem:[%s3456_s1 + $0xe0] ss:$16 sps:$4 sm:$0xff]   ;;  %v2368_v31 = vld [vmem:[%s3456_s1 + $0xe8] ss:$16 sps:$4 sm:$0xff]   ;;  %v2369_v32 = vld [vmem:[%s3456_s1 + $0x104] ss:$16 sps:$4 sm:$0xff]  }
   0xc   :  { %1310 = vmatprep.subr.bf16.mxu0 %v2339_v12  ;;  %1474 = vmatprep.subr.bf16.mxu1 %v2341_v13  ;;  %v2371_v33 = vld [vmem:[%s3456_s1 + $0x10c] ss:$16 sps:$4 sm:$0xff]   ;;  %v2373_v34 = vld [vmem:[%s3456_s1 + $0x100] ss:$16 sps:$4 sm:$0xff]   ;;  %v2374_v35 = vld [vmem:[%s3456_s1 + $0x108] ss:$16 sps:$4 sm:$0xff]  }
   0xd   :  { %v2375_v39 = vld [vmem:[%s3456_s1 + $0x124] ss:$16 sps:$4 sm:$0xff]   ;;  %v2377_v40 = vld [vmem:[%s3456_s1 + $0x12c] ss:$16 sps:$4 sm:$0xff]   ;;  %v2379_v41 = vld [vmem:[%s3456_s1 + $0x120] ss:$16 sps:$4 sm:$0xff]  }
   0xe   :  { %v2832_v42 = vshrl.u32 %v225_v36, 7  ;;  %v2380_v44 = vld [vmem:[%s3456_s1 + $0x128] ss:$16 sps:$4 sm:$0xff]   ;;  %v2381_v45 = vld [vmem:[%s3456_s1 + $0x144] ss:$16 sps:$4 sm:$0xff]  }
   0xf   :  { %1311 = vmatpush1.bf16.msra.mxu0 %v2343_v14  ;;  %1475 = vmatpush1.bf16.msra.mxu1 %v2344_v15  ;;  %v2383_v46 = vld [vmem:[%s3456_s1 + $0x14c] ss:$16 sps:$4 sm:$0xff]   ;;  %v2385_v47 = vld [vmem:[%s3456_s1 + $0x140] ss:$16 sps:$4 sm:$0xff]   ;;  %v2386_v48 = vld [vmem:[%s3456_s1 + $0x148] ss:$16 sps:$4 sm:$0xff]  }
  0x10   :  { %1312 = vmatprep.subr.bf16.mxu0 %v2345_v16  ;;  %1476 = vmatprep.subr.bf16.mxu1 %v2347_v17  ;;  %v252_v49 = vsub.s32 %v249_v43, %v2832_v42  ;;  %v2387_v50 = vld [vmem:[%s3456_s1 + $0x164] ss:$16 sps:$4 sm:$0xff]   ;;  %v2389_v51 = vld [vmem:[%s3456_s1 + $0x16c] ss:$16 sps:$4 sm:$0xff]   ;;  %v2391_v53 = vld [vmem:[%s3456_s1 + $0x160] ss:$16 sps:$4 sm:$0xff]  }
  0x11   :  { %v22_v52 = vld [vmem:[%s3455_s0] sm:$0x7f]  ;;  %v2392_v55 = vld [vmem:[%s3456_s1 + $0x168] ss:$16 sps:$4 sm:$0xff]   ;;  %v2395_v57 = vld [vmem:[%s3456_s1 + $0x18c] ss:$16 sps:$4 sm:$0xff]  }
  0x12   :  { %v253_v54 = vrot.slane %v22_v52, %v252_v49  ;;  %v2393_v56 = vld [vmem:[%s3456_s1 + $0x184] ss:$16 sps:$4 sm:$0xff]   ;;  %v2397_v59 = vld [vmem:[%s3456_s1 + $0x180] ss:$16 sps:$4 sm:$0xff]   ;;  %v2398_v61 = vld [vmem:[%s3456_s1 + $0x188] ss:$16 sps:$4 sm:$0xff]   ;;  %v246_v8 = vcombine.high %v22_v52, %v22_v52 }
  0x13   :  { %1313 = vmatpush1.bf16.msra.mxu0 %v2349_v18  ;;  %1477 = vmatpush1.bf16.msra.mxu1 %v2350_v19  ;;  %v2399_v62 = vld [vmem:[%s3456_s1 + $0x1a4] ss:$16 sps:$4 sm:$0xff]   ;;  %v2401_v63 = vld [vmem:[%s3456_s1 + $0x1ac] ss:$16 sps:$4 sm:$0xff]   ;;  %v2403_v0 = vld [vmem:[%s3456_s1 + $0x1a0] ss:$16 sps:$4 sm:$0xff]  }
  0x14   :  { %1314 = vmatprep.subr.bf16.mxu0 %v2351_v20  ;;  %1478 = vmatprep.subr.bf16.mxu1 %v2353_v21  ;;  %v261_v58 = vcombine.high %v253_v54, %v253_v54  ;;  %v2404_v1 = vld [vmem:[%s3456_s1 + $0x1a8] ss:$16 sps:$4 sm:$0xff]   ;;  %v2405_v2 = vld [vmem:[%s3456_s1 + $0x1c4] ss:$16 sps:$4 sm:$0xff]   ;;  %v2407_v3 = vld [vmem:[%s3456_s1 + $0x1cc] ss:$16 sps:$4 sm:$0xff]   ;;  %v260_v11 = vrot.slane %v246_v8, %v252_v49  ;;  %v2922_v16 = vrot.slane %v253_v54, %v252_v49 }
  0x15   :  { %v2409_v4 = vld [vmem:[%s3456_s1 + $0x1c0] ss:$16 sps:$4 sm:$0xff]   ;;  %v2410_v5 = vld [vmem:[%s3456_s1 + $0x1c8] ss:$16 sps:$4 sm:$0xff]   ;;  %v2411_v6 = vld [vmem:[%s3456_s1 + $0x1e4] ss:$16 sps:$4 sm:$0xff]  }
  0x16   :  { %v283_v60 = vrot.slane %v261_v58, %v252_v49  ;;  %v2413_v7 = vld [vmem:[%s3456_s1 + $0x1ec] ss:$16 sps:$4 sm:$0xff]   ;;  %v2415_v9 = vld [vmem:[%s3456_s1 + $0x1e0] ss:$16 sps:$4 sm:$0xff]   ;;  %v2416_v10 = vld [vmem:[%s3456_s1 + $0x1e8] ss:$16 sps:$4 sm:$0xff]   ;;  %v262_v14 = vcombine.high %v260_v11, %v260_v11  ;;  %v2929_v19 = vrot.slane %v260_v11, %v252_v49 }
  0x17   :  { %1315 = vmatpush1.bf16.msra.mxu0 %v2355_v22  ;;  %1479 = vmatpush1.bf16.msra.mxu1 %v2356_v23  ;;  %v2419_v12 = vld [vmem:[%s3456_s1 + $0x204] ss:$16 sps:$4 sm:$0xff]   ;;  %v2422_v13 = vld [vmem:[%s3456_s1 + $0x20c] ss:$16 sps:$4 sm:$0xff]   ;;  %v2417_v15 = vld [vmem:[%s3456_s1 + $0x200] ss:$16 sps:$4 sm:$0xff]  }
  0x18   :  { %1316 = vmatprep.subr.bf16.mxu0 %v2357_v24  ;;  %1480 = vmatprep.subr.bf16.mxu1 %v2359_v25  ;;  %v2420_v17 = vld [vmem:[%s3456_s1 + $0x208] ss:$16 sps:$4 sm:$0xff]   ;;  %v2927_v18 = vrot.slane %v262_v14, %v252_v49  ;;  %v2425_v20 = vld [vmem:[%s3456_s1 + $0x224] ss:$16 sps:$4 sm:$0xff]   ;;  %v2428_v21 = vld [vmem:[%s3456_s1 + $0x22c] ss:$16 sps:$4 sm:$0xff]   ;;  %v293_v22 = vcombine.high %v283_v60, %v283_v60 }
  0x19   :  { %1336 = vmatprep.mubr.bf16.mxu0 %v283_v60  ;;  %1500 = vmatprep.mubr.bf16.mxu1 %v283_v60  ;;  %v2423_v23 = vld [vmem:[%s3456_s1 + $0x220] ss:$16 sps:$4 sm:$0xff]   ;;  %v2426_v24 = vld [vmem:[%s3456_s1 + $0x228] ss:$16 sps:$4 sm:$0xff]   ;;  %v2431_v25 = vld [vmem:[%s3456_s1 + $0x244] ss:$16 sps:$4 sm:$0xff]  }
  0x1a   :  { %v2444_v36 = vld [vmem:[%s3456_s1 + $0x288] ss:$16 sps:$4 sm:$0xff]   ;;  %v2449_v37 = vld [vmem:[%s3456_s1 + $0x2a4] ss:$16 sps:$4 sm:$0xff]   ;;  %v2452_v38 = vld [vmem:[%s3456_s1 + $0x2ac] ss:$16 sps:$4 sm:$0xff]  }
  0x1b   :  { %1317 = vmatpush1.bf16.msra.mxu0 %v2361_v26  ;;  %1481 = vmatpush1.bf16.msra.mxu1 %v2362_v27  ;;  %v2434_v26 = vld [vmem:[%s3456_s1 + $0x24c] ss:$16 sps:$4 sm:$0xff]   ;;  %v2429_v27 = vld [vmem:[%s3456_s1 + $0x240] ss:$16 sps:$4 sm:$0xff]   ;;  %v2462_v49 = vld [vmem:[%s3456_s1 + $0x2e8] ss:$16 sps:$4 sm:$0xff]  }
  0x1c   :  { %1318 = vmatprep.subr.bf16.mxu0 %v2363_v28  ;;  %1482 = vmatprep.subr.bf16.mxu1 %v2365_v29  ;;  %v2432_v28 = vld [vmem:[%s3456_s1 + $0x248] ss:$16 sps:$4 sm:$0xff]   ;;  %v2437_v29 = vld [vmem:[%s3456_s1 + $0x264] ss:$16 sps:$4 sm:$0xff]   ;;  %v2458_v43 = vld [vmem:[%s3456_s1 + $0x2cc] ss:$16 sps:$4 sm:$0xff]  }
  0x1d   :  { %v2465_v52 = vld [vmem:[%s3456_s1 + $0x300] ss:$16 sps:$4 sm:$0xff]   ;;  %v2473_v54 = vld [vmem:[%s3456_s1 + $0x324] ss:$16 sps:$4 sm:$0xff]   ;;  %v2506_v11 = vld [vmem:[%s3456_s1 + $0x3cc] ss:$16 sps:$4 sm:$0xff]  }
  0x1e   :  { %v2479_v58 = vld [vmem:[%s3456_s1 + $0x344] ss:$16 sps:$4 sm:$0xff]   ;;  %v2477_v60 = vld [vmem:[%s3456_s1 + $0x340] ss:$16 sps:$4 sm:$0xff]  }
  0x1f   :  { %1319 = vmatpush1.bf16.msra.mxu0 %v2367_v30  ;;  %1483 = vmatpush1.bf16.msra.mxu1 %v2368_v31  ;;  %v2440_v30 = vld [vmem:[%s3456_s1 + $0x26c] ss:$16 sps:$4 sm:$0xff]   ;;  %v2435_v31 = vld [vmem:[%s3456_s1 + $0x260] ss:$16 sps:$4 sm:$0xff]   ;;  %v2509_v14 = vld [vmem:[%s3456_s1 + $0x3e4] ss:$16 sps:$4 sm:$0xff]  }
  0x20   :  { %1320 = vmatprep.subr.bf16.mxu0 %v2369_v32  ;;  %1484 = vmatprep.subr.bf16.mxu1 %v2371_v33  ;;  %v2438_v32 = vld [vmem:[%s3456_s1 + $0x268] ss:$16 sps:$4 sm:$0xff]   ;;  %v2443_v33 = vld [vmem:[%s3456_s1 + $0x284] ss:$16 sps:$4 sm:$0xff]   ;;  %v2495_v8 = vld [vmem:[%s3456_s1 + $0x3a0] ss:$16 sps:$4 sm:$0xff]  }
  0x23   :  { %1321 = vmatpush1.bf16.msra.mxu0 %v2373_v34  ;;  %1485 = vmatpush1.bf16.msra.mxu1 %v2374_v35  ;;  %v2446_v34 = vld [vmem:[%s3456_s1 + $0x28c] ss:$16 sps:$4 sm:$0xff]   ;;  %v2441_v35 = vld [vmem:[%s3456_s1 + $0x280] ss:$16 sps:$4 sm:$0xff]  }
  0x24   :  { %1322 = vmatprep.subr.bf16.mxu0 %v2375_v39  ;;  %1486 = vmatprep.subr.bf16.mxu1 %v2377_v40  ;;  %v2447_v39 = vld [vmem:[%s3456_s1 + $0x2a0] ss:$16 sps:$4 sm:$0xff]   ;;  %v2450_v40 = vld [vmem:[%s3456_s1 + $0x2a8] ss:$16 sps:$4 sm:$0xff]  }
  0x27   :  { %1323 = vmatpush1.bf16.msra.mxu0 %v2379_v41  ;;  %1487 = vmatpush1.bf16.msra.mxu1 %v2380_v44  ;;  %v2455_v41 = vld [vmem:[%s3456_s1 + $0x2c4] ss:$16 sps:$4 sm:$0xff]   ;;  %v2453_v44 = vld [vmem:[%s3456_s1 + $0x2c0] ss:$16 sps:$4 sm:$0xff]  }
  0x28   :  { %1324 = vmatprep.subr.bf16.mxu0 %v2381_v45  ;;  %1488 = vmatprep.subr.bf16.mxu1 %v2383_v46  ;;  %v2456_v45 = vld [vmem:[%s3456_s1 + $0x2c8] ss:$16 sps:$4 sm:$0xff]   ;;  %v2461_v46 = vld [vmem:[%s3456_s1 + $0x2e4] ss:$16 sps:$4 sm:$0xff]  }
  0x2b   :  { %1325 = vmatpush1.bf16.msra.mxu0 %v2385_v47  ;;  %1489 = vmatpush1.bf16.msra.mxu1 %v2386_v48  ;;  %v2464_v47 = vld [vmem:[%s3456_s1 + $0x2ec] ss:$16 sps:$4 sm:$0xff]   ;;  %v2459_v48 = vld [vmem:[%s3456_s1 + $0x2e0] ss:$16 sps:$4 sm:$0xff]  }
  0x2c   :  { %1326 = vmatprep.subr.bf16.mxu0 %v2387_v50  ;;  %1490 = vmatprep.subr.bf16.mxu1 %v2389_v51  ;;  %v2467_v50 = vld [vmem:[%s3456_s1 + $0x304] ss:$16 sps:$4 sm:$0xff]   ;;  %v2470_v51 = vld [vmem:[%s3456_s1 + $0x30c] ss:$16 sps:$4 sm:$0xff]  }
  0x2f   :  { %1327 = vmatpush1.bf16.msra.mxu0 %v2391_v53  ;;  %1491 = vmatpush1.bf16.msra.mxu1 %v2392_v55  ;;  %v2468_v53 = vld [vmem:[%s3456_s1 + $0x308] ss:$16 sps:$4 sm:$0xff]   ;;  %v2476_v55 = vld [vmem:[%s3456_s1 + $0x32c] ss:$16 sps:$4 sm:$0xff]  }
  0x30   :  { %1328 = vmatprep.subr.bf16.mxu0 %v2393_v56  ;;  %1492 = vmatprep.subr.bf16.mxu1 %v2395_v57  ;;  %v2471_v56 = vld [vmem:[%s3456_s1 + $0x320] ss:$16 sps:$4 sm:$0xff]   ;;  %v2474_v57 = vld [vmem:[%s3456_s1 + $0x328] ss:$16 sps:$4 sm:$0xff]  }
  0x33   :  { %1329 = vmatpush1.bf16.msra.mxu0 %v2397_v59  ;;  %1493 = vmatpush1.bf16.msra.mxu1 %v2398_v61  ;;  %v2482_v59 = vld [vmem:[%s3456_s1 + $0x34c] ss:$16 sps:$4 sm:$0xff]   ;;  %v2480_v61 = vld [vmem:[%s3456_s1 + $0x348] ss:$16 sps:$4 sm:$0xff]  }
  0x34   :  { %1330 = vmatprep.subr.bf16.mxu0 %v2399_v62  ;;  %1494 = vmatprep.subr.bf16.mxu1 %v2401_v63  ;;  %v2485_v62 = vld [vmem:[%s3456_s1 + $0x364] ss:$16 sps:$4 sm:$0xff]   ;;  %v2488_v63 = vld [vmem:[%s3456_s1 + $0x36c] ss:$16 sps:$4 sm:$0xff]  }
  0x37   :  { %1331 = vmatpush1.bf16.msra.mxu0 %v2403_v0  ;;  %1495 = vmatpush1.bf16.msra.mxu1 %v2404_v1  ;;  %v2483_v0 = vld [vmem:[%s3456_s1 + $0x360] ss:$16 sps:$4 sm:$0xff]   ;;  %v2486_v1 = vld [vmem:[%s3456_s1 + $0x368] ss:$16 sps:$4 sm:$0xff]  }
  0x38   :  { %1332 = vmatprep.subr.bf16.mxu0 %v2405_v2  ;;  %1496 = vmatprep.subr.bf16.mxu1 %v2407_v3  ;;  %v2491_v2 = vld [vmem:[%s3456_s1 + $0x384] ss:$16 sps:$4 sm:$0xff]   ;;  %v2494_v3 = vld [vmem:[%s3456_s1 + $0x38c] ss:$16 sps:$4 sm:$0xff]  }
  0x3b   :  { %1333 = vmatpush1.bf16.msra.mxu0 %v2409_v4  ;;  %1497 = vmatpush1.bf16.msra.mxu1 %v2410_v5  ;;  %v2489_v4 = vld [vmem:[%s3456_s1 + $0x380] ss:$16 sps:$4 sm:$0xff]   ;;  %v2492_v5 = vld [vmem:[%s3456_s1 + $0x388] ss:$16 sps:$4 sm:$0xff]  }
  0x3c   :  { %1334 = vmatprep.subr.bf16.mxu0 %v2411_v6  ;;  %1498 = vmatprep.subr.bf16.mxu1 %v2413_v7  ;;  %v2497_v6 = vld [vmem:[%s3456_s1 + $0x3a4] ss:$16 sps:$4 sm:$0xff]   ;;  %v2500_v7 = vld [vmem:[%s3456_s1 + $0x3ac] ss:$16 sps:$4 sm:$0xff]  }
  0x3f   :  { %1335 = vmatpush1.bf16.msra.mxu0 %v2415_v9  ;;  %1499 = vmatpush1.bf16.msra.mxu1 %v2416_v10  ;;  %v2498_v9 = vld [vmem:[%s3456_s1 + $0x3a8] ss:$16 sps:$4 sm:$0xff]   ;;  %v2503_v10 = vld [vmem:[%s3456_s1 + $0x3c4] ss:$16 sps:$4 sm:$0xff]  }
  0x40   :  { %1345 = vmatprep.subr.bf16.mxu0 %v2419_v12  ;;  %1509 = vmatprep.subr.bf16.mxu1 %v2422_v13  ;;  %v2501_v12 = vld [vmem:[%s3456_s1 + $0x3c0] ss:$16 sps:$4 sm:$0xff]   ;;  %v2504_v13 = vld [vmem:[%s3456_s1 + $0x3c8] ss:$16 sps:$4 sm:$0xff]  }
  0x42   :  { %1337 = vmatmul.mubr.bf16.vlgmr.msra.gmra.mrb[0].mxu0 %v2922_v16  ;;  %1501 = vmatmul.mubr.bf16.vlgmr.msra.gmra.mrb[0].mxu1 %v2922_v16 }
  0x43   :  { %1346 = vmatpush1.bf16.msra.mxu0 %v2417_v15  ;;  %1510 = vmatpush1.bf16.msra.mxu1 %v2420_v17  ;;  %v2512_v15 = vld [vmem:[%s3456_s1 + $0x3ec] ss:$16 sps:$4 sm:$0xff]   ;;  %v2507_v17 = vld [vmem:[%s3456_s1 + $0x3e0] ss:$16 sps:$4 sm:$0xff]  }
  0x44   :  { %1347 = vmatprep.subr.bf16.mxu0 %v2425_v20  ;;  %1511 = vmatprep.subr.bf16.mxu1 %v2428_v21  ;;  %v2510_v20 = vld [vmem:[%s3456_s1 + $0x3e8] ss:$16 sps:$4 sm:$0xff]   ;;  %v2515_v21 = vld [vmem:[%s3456_s1 + $0x404] ss:$16 sps:$4 sm:$0xff]  }
  0x45   :  { %1377 = vmatprep.mubr.bf16.mxu0 %v293_v22  ;;  %1541 = vmatprep.mubr.bf16.mxu1 %v293_v22  ;;  %v2518_v22 = vld [vmem:[%s3456_s1 + $0x40c] ss:$16 sps:$4 sm:$0xff]  }
  0x47   :  { %1348 = vmatpush1.bf16.msra.mxu0 %v2423_v23  ;;  %1512 = vmatpush1.bf16.msra.mxu1 %v2426_v24  ;;  %v2513_v23 = vld [vmem:[%s3456_s1 + $0x400] ss:$16 sps:$4 sm:$0xff]   ;;  %v291_v24 = vcombine.high %v2922_v16, %v2922_v16 }
  0x48   :  { %1349 = vmatprep.subr.bf16.mxu0 %v2431_v25  ;;  %1513 = vmatprep.subr.bf16.mxu1 %v2434_v26  ;;  %v2516_v25 = vld [vmem:[%s3456_s1 + $0x408] ss:$16 sps:$4 sm:$0xff]   ;;  %v2521_v26 = vld [vmem:[%s3456_s1 + $0x424] ss:$16 sps:$4 sm:$0xff]   ;;  %v2519_v16 = vld [vmem:[%s3456_s1 + $0x420] ss:$16 sps:$4 sm:$0xff]  }
  0x4b   :  { %1350 = vmatpush1.bf16.msra.mxu0 %v2429_v27  ;;  %1514 = vmatpush1.bf16.msra.mxu1 %v2432_v28  ;;  %v2524_v27 = vld [vmem:[%s3456_s1 + $0x42c] ss:$16 sps:$4 sm:$0xff]   ;;  %v2522_v28 = vld [vmem:[%s3456_s1 + $0x428] ss:$16 sps:$4 sm:$0xff]  }
  0x4c   :  { %1351 = vmatprep.subr.bf16.mxu0 %v2437_v29  ;;  %1515 = vmatprep.subr.bf16.mxu1 %v2440_v30  ;;  %v2527_v29 = vld [vmem:[%s3456_s1 + $0x444] ss:$16 sps:$4 sm:$0xff]   ;;  %v2530_v30 = vld [vmem:[%s3456_s1 + $0x44c] ss:$16 sps:$4 sm:$0xff]  }
  0x4f   :  { %1352 = vmatpush1.bf16.msra.mxu0 %v2435_v31  ;;  %1516 = vmatpush1.bf16.msra.mxu1 %v2438_v32  ;;  %v2525_v31 = vld [vmem:[%s3456_s1 + $0x440] ss:$16 sps:$4 sm:$0xff]   ;;  %v2528_v32 = vld [vmem:[%s3456_s1 + $0x448] ss:$16 sps:$4 sm:$0xff]  }
  0x50   :  { %1353 = vmatprep.subr.bf16.mxu0 %v2443_v33  ;;  %1517 = vmatprep.subr.bf16.mxu1 %v2446_v34  ;;  %v2533_v33 = vld [vmem:[%s3456_s1 + $0x464] ss:$16 sps:$4 sm:$0xff]   ;;  %v2536_v34 = vld [vmem:[%s3456_s1 + $0x46c] ss:$16 sps:$4 sm:$0xff]  }
  0x53   :  { %1354 = vmatpush1.bf16.msra.mxu0 %v2441_v35  ;;  %1518 = vmatpush1.bf16.msra.mxu1 %v2444_v36  ;;  %v2534_v35 = vld [vmem:[%s3456_s1 + $0x468] ss:$16 sps:$4 sm:$0xff]   ;;  %v2539_v36 = vld [vmem:[%s3456_s1 + $0x484] ss:$16 sps:$4 sm:$0xff]  }
  0x54   :  { %1355 = vmatprep.subr.bf16.mxu0 %v2449_v37  ;;  %1519 = vmatprep.subr.bf16.mxu1 %v2452_v38  ;;  %v2542_v37 = vld [vmem:[%s3456_s1 + $0x48c] ss:$16 sps:$4 sm:$0xff]   ;;  %v2537_v38 = vld [vmem:[%s3456_s1 + $0x480] ss:$16 sps:$4 sm:$0xff]  }
  0x57   :  { %1356 = vmatpush1.bf16.msra.mxu0 %v2447_v39  ;;  %1520 = vmatpush1.bf16.msra.mxu1 %v2450_v40  ;;  %v2540_v39 = vld [vmem:[%s3456_s1 + $0x488] ss:$16 sps:$4 sm:$0xff]   ;;  %v2545_v40 = vld [vmem:[%s3456_s1 + $0x4a4] ss:$16 sps:$4 sm:$0xff]  }
  0x58   :  { %1357 = vmatprep.subr.bf16.mxu0 %v2455_v41  ;;  %1521 = vmatprep.subr.bf16.mxu1 %v2458_v43  ;;  %v2548_v41 = vld [vmem:[%s3456_s1 + $0x4ac] ss:$16 sps:$4 sm:$0xff]   ;;  %v2543_v43 = vld [vmem:[%s3456_s1 + $0x4a0] ss:$16 sps:$4 sm:$0xff]  }
  0x5b   :  { %1358 = vmatpush1.bf16.msra.mxu0 %v2453_v44  ;;  %1522 = vmatpush1.bf16.msra.mxu1 %v2456_v45  ;;  %v2546_v44 = vld [vmem:[%s3456_s1 + $0x4a8] ss:$16 sps:$4 sm:$0xff]   ;;  %v2551_v45 = vld [vmem:[%s3456_s1 + $0x4c4] ss:$16 sps:$4 sm:$0xff]  }
  0x5c   :  { %1359 = vmatprep.subr.bf16.mxu0 %v2461_v46  ;;  %1523 = vmatprep.subr.bf16.mxu1 %v2464_v47  ;;  %v2554_v46 = vld [vmem:[%s3456_s1 + $0x4cc] ss:$16 sps:$4 sm:$0xff]   ;;  %v2549_v47 = vld [vmem:[%s3456_s1 + $0x4c0] ss:$16 sps:$4 sm:$0xff]  }
  0x5f   :  { %1360 = vmatpush1.bf16.msra.mxu0 %v2459_v48  ;;  %1524 = vmatpush1.bf16.msra.mxu1 %v2462_v49  ;;  %v2552_v48 = vld [vmem:[%s3456_s1 + $0x4c8] ss:$16 sps:$4 sm:$0xff]   ;;  %v2557_v49 = vld [vmem:[%s3456_s1 + $0x4e4] ss:$16 sps:$4 sm:$0xff]  }
  0x60   :  { %1361 = vmatprep.subr.bf16.mxu0 %v2467_v50  ;;  %1525 = vmatprep.subr.bf16.mxu1 %v2470_v51  ;;  %v2560_v50 = vld [vmem:[%s3456_s1 + $0x4ec] ss:$16 sps:$4 sm:$0xff]   ;;  %v2555_v51 = vld [vmem:[%s3456_s1 + $0x4e0] ss:$16 sps:$4 sm:$0xff]  }
  0x63   :  { %1362 = vmatpush1.bf16.msra.mxu0 %v2465_v52  ;;  %1526 = vmatpush1.bf16.msra.mxu1 %v2468_v53  ;;  %v2558_v52 = vld [vmem:[%s3456_s1 + $0x4e8] ss:$16 sps:$4 sm:$0xff]   ;;  %v2563_v53 = vld [vmem:[%s3456_s1 + $0x504] ss:$16 sps:$4 sm:$0xff]  }
  0x64   :  { %1363 = vmatprep.subr.bf16.mxu0 %v2473_v54  ;;  %1527 = vmatprep.subr.bf16.mxu1 %v2476_v55  ;;  %v2566_v54 = vld [vmem:[%s3456_s1 + $0x50c] ss:$16 sps:$4 sm:$0xff]   ;;  %v2561_v55 = vld [vmem:[%s3456_s1 + $0x500] ss:$16 sps:$4 sm:$0xff]  }
  0x67   :  { %1364 = vmatpush1.bf16.msra.mxu0 %v2471_v56  ;;  %1528 = vmatpush1.bf16.msra.mxu1 %v2474_v57  ;;  %v2564_v56 = vld [vmem:[%s3456_s1 + $0x508] ss:$16 sps:$4 sm:$0xff]   ;;  %v2569_v57 = vld [vmem:[%s3456_s1 + $0x524] ss:$16 sps:$4 sm:$0xff]  }
  0x68   :  { %1365 = vmatprep.subr.bf16.mxu0 %v2479_v58  ;;  %1529 = vmatprep.subr.bf16.mxu1 %v2482_v59  ;;  %v2572_v58 = vld [vmem:[%s3456_s1 + $0x52c] ss:$16 sps:$4 sm:$0xff]  }
  0x6b   :  { %1366 = vmatpush1.bf16.msra.mxu0 %v2477_v60  ;;  %1530 = vmatpush1.bf16.msra.mxu1 %v2480_v61 }
  0x6c   :  { %1367 = vmatprep.subr.bf16.mxu0 %v2485_v62  ;;  %1531 = vmatprep.subr.bf16.mxu1 %v2488_v63 }
  0x6f   :  { %1368 = vmatpush1.bf16.msra.mxu0 %v2483_v0  ;;  %1532 = vmatpush1.bf16.msra.mxu1 %v2486_v1 }
  0x70   :  { %1369 = vmatprep.subr.bf16.mxu0 %v2491_v2  ;;  %1533 = vmatprep.subr.bf16.mxu1 %v2494_v3 }
  0x73   :  { %1370 = vmatpush1.bf16.msra.mxu0 %v2489_v4  ;;  %1534 = vmatpush1.bf16.msra.mxu1 %v2492_v5 }
  0x74   :  { %1371 = vmatprep.subr.bf16.mxu0 %v2497_v6  ;;  %1535 = vmatprep.subr.bf16.mxu1 %v2500_v7 }
  0x77   :  { %1372 = vmatpush1.bf16.msra.mxu0 %v2495_v8  ;;  %1536 = vmatpush1.bf16.msra.mxu1 %v2498_v9 }
  0x78   :  { %1373 = vmatprep.subr.bf16.mxu0 %v2503_v10  ;;  %1537 = vmatprep.subr.bf16.mxu1 %v2506_v11 }
  0x7b   :  { %1374 = vmatpush1.bf16.msra.mxu0 %v2501_v12  ;;  %1538 = vmatpush1.bf16.msra.mxu1 %v2504_v13 }
  0x7c   :  { %1375 = vmatprep.subr.bf16.mxu0 %v2509_v14  ;;  %1539 = vmatprep.subr.bf16.mxu1 %v2512_v15 }
  0x7f   :  { %1376 = vmatpush1.bf16.msra.mxu0 %v2507_v17  ;;  %1540 = vmatpush1.bf16.msra.mxu1 %v2510_v20 }
  0x80   :  { %1386 = vmatprep.subr.bf16.mxu0 %v2515_v21  ;;  %1550 = vmatprep.subr.bf16.mxu1 %v2518_v22 }
  0x82   :  { %1378 = vmatmul.mubr.bf16.vlgmr.msra.gmra.mrb[0].mxu0 %v291_v24  ;;  %1542 = vmatmul.mubr.bf16.vlgmr.msra.gmra.mrb[0].mxu1 %v291_v24 }
  0x83   :  { %1387 = vmatpush1.bf16.msra.mxu0 %v2513_v23  ;;  %1551 = vmatpush1.bf16.msra.mxu1 %v2516_v25 }
  0x84   :  { %1388 = vmatprep.subr.bf16.mxu0 %v2521_v26  ;;  %1552 = vmatprep.subr.bf16.mxu1 %v2524_v27 }
  0x85   :  { %1418 = vmatprep.mubr.bf16.mxu0 %v2927_v18  ;;  %1582 = vmatprep.mubr.bf16.mxu1 %v2927_v18  ;;  %v2531_v18 = vld [vmem:[%s3456_s1 + $0x460] ss:$16 sps:$4 sm:$0xff]  }
  0x87   :  { %1389 = vmatpush1.bf16.msra.mxu0 %v2519_v16  ;;  %1553 = vmatpush1.bf16.msra.mxu1 %v2522_v28 }
  0x88   :  { %1390 = vmatprep.subr.bf16.mxu0 %v2527_v29  ;;  %1554 = vmatprep.subr.bf16.mxu1 %v2530_v30 }
  0x8b   :  { %1391 = vmatpush1.bf16.msra.mxu0 %v2525_v31  ;;  %1555 = vmatpush1.bf16.msra.mxu1 %v2528_v32 }
  0x8c   :  { %1392 = vmatprep.subr.bf16.mxu0 %v2533_v33  ;;  %1556 = vmatprep.subr.bf16.mxu1 %v2536_v34 }
  0x8f   :  { %1393 = vmatpush1.bf16.msra.mxu0 %v2531_v18  ;;  %1557 = vmatpush1.bf16.msra.mxu1 %v2534_v35 }
  0x90   :  { %1394 = vmatprep.subr.bf16.mxu0 %v2539_v36  ;;  %1558 = vmatprep.subr.bf16.mxu1 %v2542_v37 }
  0x93   :  { %1395 = vmatpush1.bf16.msra.mxu0 %v2537_v38  ;;  %1559 = vmatpush1.bf16.msra.mxu1 %v2540_v39 }
  0x94   :  { %1396 = vmatprep.subr.bf16.mxu0 %v2545_v40  ;;  %1560 = vmatprep.subr.bf16.mxu1 %v2548_v41 }
  0x97   :  { %1397 = vmatpush1.bf16.msra.mxu0 %v2543_v43  ;;  %1561 = vmatpush1.bf16.msra.mxu1 %v2546_v44 }
  0x98   :  { %1398 = vmatprep.subr.bf16.mxu0 %v2551_v45  ;;  %1562 = vmatprep.subr.bf16.mxu1 %v2554_v46 }
  0x9b   :  { %1399 = vmatpush1.bf16.msra.mxu0 %v2549_v47  ;;  %1563 = vmatpush1.bf16.msra.mxu1 %v2552_v48 }
  0x9c   :  { %1400 = vmatprep.subr.bf16.mxu0 %v2557_v49  ;;  %1564 = vmatprep.subr.bf16.mxu1 %v2560_v50 }
  0x9f   :  { %1401 = vmatpush1.bf16.msra.mxu0 %v2555_v51  ;;  %1565 = vmatpush1.bf16.msra.mxu1 %v2558_v52 }
  0xa0   :  { %1402 = vmatprep.subr.bf16.mxu0 %v2563_v53  ;;  %1566 = vmatprep.subr.bf16.mxu1 %v2566_v54 }
  0xa1   :  { %10 = vsyncpa [#allocation3], 0  ;;  %v2567_v59 = vld [vmem:[%s3456_s1 + $0x520] ss:$16 sps:$4 sm:$0xff]   ;;  %v2570_v60 = vld [vmem:[%s3456_s1 + $0x528] ss:$16 sps:$4 sm:$0xff]   ;;  %v292_v34 = vcombine.high %v2929_v19, %v2929_v19 }
  0xa2   :  { %v2575_v61 = vld [vmem:[%s3456_s1 + $0x544] ss:$16 sps:$4 sm:$0xff]   ;;  %v2578_v62 = vld [vmem:[%s3456_s1 + $0x54c] ss:$16 sps:$4 sm:$0xff]   ;;  %v2573_v63 = vld [vmem:[%s3456_s1 + $0x540] ss:$16 sps:$4 sm:$0xff]  }
  0xa3   :  { %1403 = vmatpush1.bf16.msra.mxu0 %v2561_v55  ;;  %1567 = vmatpush1.bf16.msra.mxu1 %v2564_v56  ;;  %v2576_v0 = vld [vmem:[%s3456_s1 + $0x548] ss:$16 sps:$4 sm:$0xff]   ;;  %v2581_v1 = vld [vmem:[%s3456_s1 + $0x564] ss:$16 sps:$4 sm:$0xff]   ;;  %v2584_v2 = vld [vmem:[%s3456_s1 + $0x56c] ss:$16 sps:$4 sm:$0xff]  }
  0xa4   :  { %1404 = vmatprep.subr.bf16.mxu0 %v2569_v57  ;;  %1568 = vmatprep.subr.bf16.mxu1 %v2572_v58  ;;  %v2579_v3 = vld [vmem:[%s3456_s1 + $0x560] ss:$16 sps:$4 sm:$0xff]   ;;  %v2582_v4 = vld [vmem:[%s3456_s1 + $0x568] ss:$16 sps:$4 sm:$0xff]   ;;  %v2587_v5 = vld [vmem:[%s3456_s1 + $0x584] ss:$16 sps:$4 sm:$0xff]  }
  0xa5   :  { %v2590_v6 = vld [vmem:[%s3456_s1 + $0x58c] ss:$16 sps:$4 sm:$0xff]   ;;  %v2585_v7 = vld [vmem:[%s3456_s1 + $0x580] ss:$16 sps:$4 sm:$0xff]   ;;  %v2588_v8 = vld [vmem:[%s3456_s1 + $0x588] ss:$16 sps:$4 sm:$0xff]  }
  0xa6   :  { %v2593_v9 = vld [vmem:[%s3456_s1 + $0x5a4] ss:$16 sps:$4 sm:$0xff]   ;;  %v2596_v10 = vld [vmem:[%s3456_s1 + $0x5ac] ss:$16 sps:$4 sm:$0xff]   ;;  %v2591_v11 = vld [vmem:[%s3456_s1 + $0x5a0] ss:$16 sps:$4 sm:$0xff]  }
  0xa7   :  { %1405 = vmatpush1.bf16.msra.mxu0 %v2567_v59  ;;  %1569 = vmatpush1.bf16.msra.mxu1 %v2570_v60  ;;  %v2594_v12 = vld [vmem:[%s3456_s1 + $0x5a8] ss:$16 sps:$4 sm:$0xff]   ;;  %v2599_v13 = vld [vmem:[%s3456_s1 + $0x5c4] ss:$16 sps:$4 sm:$0xff]   ;;  %v2602_v14 = vld [vmem:[%s3456_s1 + $0x5cc] ss:$16 sps:$4 sm:$0xff]  }
  0xa8   :  { %1406 = vmatprep.subr.bf16.mxu0 %v2575_v61  ;;  %1570 = vmatprep.subr.bf16.mxu1 %v2578_v62  ;;  %v2597_v15 = vld [vmem:[%s3456_s1 + $0x5c0] ss:$16 sps:$4 sm:$0xff]   ;;  %v2600_v17 = vld [vmem:[%s3456_s1 + $0x5c8] ss:$16 sps:$4 sm:$0xff]   ;;  %v2605_v20 = vld [vmem:[%s3456_s1 + $0x5e4] ss:$16 sps:$4 sm:$0xff]  }
  0xa9   :  { %v2608_v21 = vld [vmem:[%s3456_s1 + $0x5ec] ss:$16 sps:$4 sm:$0xff]   ;;  %v2603_v22 = vld [vmem:[%s3456_s1 + $0x5e0] ss:$16 sps:$4 sm:$0xff]   ;;  %v2606_v23 = vld [vmem:[%s3456_s1 + $0x5e8] ss:$16 sps:$4 sm:$0xff]  }
  0xaa   :  { %v2612_v24 = vld [vmem:[%s3456_s1 + $0x604] ss:$16 sps:$4 sm:$0xff]   ;;  %v2615_v25 = vld [vmem:[%s3456_s1 + $0x60c] ss:$16 sps:$4 sm:$0xff]   ;;  %v2610_v26 = vld [vmem:[%s3456_s1 + $0x600] ss:$16 sps:$4 sm:$0xff]  }
  0xab   :  { %1407 = vmatpush1.bf16.msra.mxu0 %v2573_v63  ;;  %1571 = vmatpush1.bf16.msra.mxu1 %v2576_v0  ;;  %v2613_v27 = vld [vmem:[%s3456_s1 + $0x608] ss:$16 sps:$4 sm:$0xff]   ;;  %v2618_v16 = vld [vmem:[%s3456_s1 + $0x624] ss:$16 sps:$4 sm:$0xff]   ;;  %v2621_v28 = vld [vmem:[%s3456_s1 + $0x62c] ss:$16 sps:$4 sm:$0xff]  }
  0xac   :  { %1408 = vmatprep.subr.bf16.mxu0 %v2581_v1  ;;  %1572 = vmatprep.subr.bf16.mxu1 %v2584_v2  ;;  %v2616_v29 = vld [vmem:[%s3456_s1 + $0x620] ss:$16 sps:$4 sm:$0xff]   ;;  %v2619_v30 = vld [vmem:[%s3456_s1 + $0x628] ss:$16 sps:$4 sm:$0xff]   ;;  %v2683_v33 = vmov 0   ;;  %vm1300_vm0 = vcmask 261120  }
  0xad   :  { %v2622_v31 = vld [vmem:[%s3458_s3 + $0x40] sm:$0xff]   ;;  %v2626_v36 = vld [vmem:[%s3458_s3 + $0x48] sm:$0xff]   ;;  %v2630_v39 = vld [vmem:[%s3458_s3 + $0x50] sm:$0xff]   ;;  %v227_v0 = vsub.s32 0, %v2832_v42  ;;  %v235_v1 = vsub.s32 2, %v2832_v42  ;;  %vm1983_vm1 = vcmask 1041408  }
  0xae   :  { %v2623_v32 = vld [vmem:[%s3458_s3 + $0xc0] sm:$0xff]   ;;  %v2627_v37 = vld [vmem:[%s3458_s3 + $0xc8] sm:$0xff]   ;;  %v2631_v40 = vld [vmem:[%s3458_s3 + $0xd0] sm:$0xff]  }
  0xaf   :  { %1409 = vmatpush1.bf16.msra.mxu0 %v2579_v3  ;;  %1573 = vmatpush1.bf16.msra.mxu1 %v2582_v4  ;;  %v2624_v18 = vld [vmem:[%s3458_s3] sm:$0xff]   ;;  %v2629_v38 = vld [vmem:[%s3458_s3 + $0x88] sm:$0xff]   ;;  %v2632_v41 = vld [vmem:[%s3458_s3 + $0x10] sm:$0xff]   ;;  %v231_v3 = vsub.s32 1, %v2832_v42  ;;  %v239_v4 = vsub.s32 3, %v2832_v42 }
  0xb0   :  { %1410 = vmatprep.subr.bf16.mxu0 %v2587_v5  ;;  %1574 = vmatprep.subr.bf16.mxu1 %v2590_v6  ;;  %v2625_v35 = vld [vmem:[%s3458_s3 + $0x80] sm:$0xff]   ;;  %v2633_v43 = vld [vmem:[%s3458_s3 + $0x90] sm:$0xff]   ;;  %v2634_v44 = vld [vmem:[%s3458_s3 + $0x58] sm:$0xff]  }
  0xb1   :  { %v2635_v45 = vld [vmem:[%s3458_s3 + $0xd8] sm:$0xff]   ;;  %v2638_v48 = vld [vmem:[%s3458_s3 + $0x60] sm:$0xff]   ;;  %v2642_v52 = vld [vmem:[%s3458_s3 + $0x68] sm:$0xff]  }
  0xb2   :  { %v2636_v46 = vld [vmem:[%s3458_s3 + $0x18] sm:$0xff]   ;;  %v2639_v49 = vld [vmem:[%s3458_s3 + $0xe0] sm:$0xff]   ;;  %v2643_v53 = vld [vmem:[%s3458_s3 + $0xe8] sm:$0xff]  }
  0xb3   :  { %1411 = vmatpush1.bf16.msra.mxu0 %v2585_v7  ;;  %1575 = vmatpush1.bf16.msra.mxu1 %v2588_v8  ;;  %v2637_v47 = vld [vmem:[%s3458_s3 + $0x98] sm:$0xff]   ;;  %v2640_v50 = vld [vmem:[%s3458_s3 + $0x20] sm:$0xff]   ;;  %v2644_v54 = vld [vmem:[%s3458_s3 + $0x28] sm:$0xff]  }
  0xb4   :  { %1412 = vmatprep.subr.bf16.mxu0 %v2593_v9  ;;  %1576 = vmatprep.subr.bf16.mxu1 %v2596_v10  ;;  %v2641_v51 = vld [vmem:[%s3458_s3 + $0xa0] sm:$0xff]   ;;  %v2645_v55 = vld [vmem:[%s3458_s3 + $0xa8] sm:$0xff]   ;;  %v2646_v56 = vld [vmem:[%s3458_s3 + $0x70] sm:$0xff]  }
  0xb5   :  { %v2647_v57 = vld [vmem:[%s3458_s3 + $0xf0] sm:$0xff]   ;;  %v2650_v60 = vld [vmem:[%s3458_s3 + $0x78] sm:$0xff]   ;;  %v223_v2 = vld [vmem:[%s3457_s2] sm:$0xf] }
  0xb6   :  { %v2648_v58 = vld [vmem:[%s3458_s3 + $0x30] sm:$0xff]   ;;  %v2651_v61 = vld [vmem:[%s3458_s3 + $0xf8] sm:$0xff]   ;;  %v228_v5 = vrot.slane %v223_v2, %v227_v0  ;;  %v236_v6 = vrot.slane %v223_v2, %v235_v1  ;;  %v232_v7 = vrot.slane %v223_v2, %v231_v3  ;;  %v240_v8 = vrot.slane %v223_v2, %v239_v4 }
  0xb7   :  { %1413 = vmatpush1.bf16.msra.mxu0 %v2591_v11  ;;  %1577 = vmatpush1.bf16.msra.mxu1 %v2594_v12  ;;  %v2649_v59 = vld [vmem:[%s3458_s3 + $0xb0] sm:$0xff]   ;;  %v2652_v62 = vld [vmem:[%s3458_s3 + $0x38] sm:$0xff]  }
  0xb8   :  { %1414 = vmatprep.subr.bf16.mxu0 %v2599_v13  ;;  %1578 = vmatprep.subr.bf16.mxu1 %v2602_v14  ;;  %v2653_v63 = vld [vmem:[%s3458_s3 + $0xb8] sm:$0xff]  }
  0xbb   :  { %1415 = vmatpush1.bf16.msra.mxu0 %v2597_v15  ;;  %1579 = vmatpush1.bf16.msra.mxu1 %v2600_v17 }
  0xbc   :  { %1416 = vmatprep.subr.bf16.mxu0 %v2605_v20  ;;  %1580 = vmatprep.subr.bf16.mxu1 %v2608_v21 }
  0xbf   :  { %1417 = vmatpush1.bf16.msra.mxu0 %v2603_v22  ;;  %1581 = vmatpush1.bf16.msra.mxu1 %v2606_v23 }
  0xc0   :  { %1427 = vmatprep.subr.bf16.mxu0 %v2612_v24  ;;  %1591 = vmatprep.subr.bf16.mxu1 %v2615_v25 }
  0xc2   :  { %1419 = vmatmul.mubr.bf16.vlgmr.msra.gmra.mrb[0].mxu0 %v2929_v19  ;;  %1583 = vmatmul.mubr.bf16.vlgmr.msra.gmra.mrb[0].mxu1 %v2929_v19  ;;  %v2628_v19 = vld [vmem:[%s3458_s3 + $0x8] sm:$0xff]  }
  0xc3   :  { %1428 = vmatpush1.bf16.msra.mxu0 %v2610_v26  ;;  %1592 = vmatpush1.bf16.msra.mxu1 %v2613_v27 }
  0xc4   :  { %1429 = vmatprep.subr.bf16.mxu0 %v2618_v16  ;;  %1593 = vmatprep.subr.bf16.mxu1 %v2621_v28 }
  0xc5   :  { %1459 = vmatprep.mubr.bf16.mxu0 %v2683_v33  ;;  %1623 = vmatprep.mubr.bf16.mxu1 %v2683_v33 }
  0xc7   :  { %1430 = vmatpush1.bf16.msra.mxu0 %v2616_v29  ;;  %1594 = vmatpush1.bf16.msra.mxu1 %v2619_v30 }
  0xc8   :  { %2246 = vmatprep.subr.bf16.mxu0 %v2622_v31  ;;  %2268 = vmatprep.subr.bf16.mxu1 %v2623_v32  ;;  %v2213_v32 = vld [vmem:[%s3459_s4] ss:$0 sm:$0xff]  ;;  %s2684_s4 = smov [#allocation2]  }
  0xc9   :  { %s2003_s19 = sshll.u32 %s2684_s4, 4  ;;  %s2004_s19 = int_to_ptr.vmem [resolvable:$true] %s2003_s19 }
  0xca   :  { %s2658_s0 = scalar_lea.vmem %s2004_s19, 32  ;;  %p2663_p1 = scmp.lt.s32.totalorder %s2004_s19, %s2004_s19 }
  0xcb   :  { %p2659_p0 = scmp.ne.s32.totalorder %s2004_s19, %s2658_s0  ;;  %p2664_p2 = scmp.lt.s32.totalorder %s2658_s0, %s2658_s0 }
  0xcd   :  { %p2665_p3 = por %p2664_p2, %p2663_p1 }
  0xce   :  { %2211 = vmatmul.mubr.msk.bf16.vlgmr.msra.gmra.mrb[0].mxu0 %vm1300_vm0, %v292_v34  ;;  %2212 = vmatmul.mubr.msk.bf16.vlgmr.msra.gmra.mrb[0].mxu1 %vm1300_vm0, %v292_v34 }
  0xcf   :  { %2247 = vmatpush3.bf16.msra.mxu0 %v2624_v18  ;;  %2269 = vmatpush3.bf16.msra.mxu1 %v2625_v35  ;;  %p2666_p4 = pnand %p2665_p3, %p2659_p0 }
  0xd0   :  { %2248 = vmatprep.subr.bf16.mxu0 %v2626_v36  ;;  %2270 = vmatprep.subr.bf16.mxu1 %v2627_v37 }
  0xd3   :  { %2249 = vmatpush3.bf16.msra.mxu0 %v2628_v19  ;;  %2271 = vmatpush3.bf16.msra.mxu1 %v2629_v38 }
  0xd4   :  { %2250 = vmatprep.subr.bf16.mxu0 %v2630_v39  ;;  %2272 = vmatprep.subr.bf16.mxu1 %v2631_v40 }
  0xd7   :  { %2251 = vmatpush3.bf16.msra.mxu0 %v2632_v41  ;;  %2273 = vmatpush3.bf16.msra.mxu1 %v2633_v43 }
  0xd8   :  { %2252 = vmatprep.subr.bf16.mxu0 %v2634_v44  ;;  %2274 = vmatprep.subr.bf16.mxu1 %v2635_v45 }
  0xdb   :  { %2253 = vmatpush3.bf16.msra.mxu0 %v2636_v46  ;;  %2275 = vmatpush3.bf16.msra.mxu1 %v2637_v47 }
  0xdc   :  { %2254 = vmatprep.subr.bf16.mxu0 %v2638_v48  ;;  %2276 = vmatprep.subr.bf16.mxu1 %v2639_v49 }
  0xdf   :  { %2255 = vmatpush3.bf16.msra.mxu0 %v2640_v50  ;;  %2277 = vmatpush3.bf16.msra.mxu1 %v2641_v51 }
  0xe0   :  { %2256 = vmatprep.subr.bf16.mxu0 %v2642_v52  ;;  %2278 = vmatprep.subr.bf16.mxu1 %v2643_v53 }
  0xe3   :  { %2257 = vmatpush3.bf16.msra.mxu0 %v2644_v54  ;;  %2279 = vmatpush3.bf16.msra.mxu1 %v2645_v55 }
  0xe4   :  { %2258 = vmatprep.subr.bf16.mxu0 %v2646_v56  ;;  %2280 = vmatprep.subr.bf16.mxu1 %v2647_v57 }
  0xe7   :  { %2259 = vmatpush3.bf16.msra.mxu0 %v2648_v58  ;;  %2281 = vmatpush3.bf16.msra.mxu1 %v2649_v59 }
  0xe8   :  { %2260 = vmatprep.subr.bf16.mxu0 %v2650_v60  ;;  %2282 = vmatprep.subr.bf16.mxu1 %v2651_v61 }
  0xeb   :  { %2261 = vmatpush3.bf16.msra.mxu0 %v2652_v62  ;;  %2283 = vmatpush3.bf16.msra.mxu1 %v2653_v63 }
 0x1a1   :  { %v1461_v9 = vpop.f32.mrb[0].mxu0  ;;  %v1625_v10 = vpop.f32.mrb[0].mxu1 }
 0x1a2   :  { %v2290_v11 = vadd.f32 %v1461_v9, %v228_v5  ;;  %v2292_v12 = vadd.f32 %v1625_v10, %v236_v6  ;;  %v1463_v13 = vpop.f32.mrb[1].mxu0  ;;  %v1627_v14 = vpop.f32.mrb[1].mxu1 }
 0x1a3   :  { %v2291_v15 = vadd.f32 %v1463_v13, %v232_v7  ;;  %v2293_v17 = vadd.f32 %v1627_v14, %v240_v8  ;;  %v1465_v20 = vpop.f32.mrb[2].mxu0  ;;  %v1629_v21 = vpop.f32.mrb[2].mxu1 }
 0x1a4   :  { %v1632_v22 = vmax.f32 %v2290_v11, 0.0  ;;  %v1634_v23 = vmax.f32 %v2292_v12, 0.0  ;;  %v1466_v24 = vpop.f32.mrb[3].mxu0  ;;  %v1630_v25 = vpop.f32.mrb[3].mxu1 }
 0x1a5   :  { %v1633_v26 = vmax.f32 %v2291_v15, 0.0  ;;  %v1635_v42 = vmax.f32 %v2293_v17, 0.0 }
 0x1a6   :  { %v1636_v28 = vpack.c.bf16 %v1632_v22, %v1632_v22  ;;  %v1638_v29 = vpack.c.bf16 %v1634_v23, %v1634_v23 }
 0x1a7   :  { %v1637_v27 = vpack.c.bf16 %v1633_v26, %v1633_v26  ;;  %v1639_v16 = vpack.c.bf16 %v1635_v42, %v1635_v42 }
 0x1a9   :  { %1935 = vmatprep.mubr.bf16.mxu0 %v1637_v27  ;;  %1975 = vmatprep.mubr.bf16.mxu1 %v1639_v16 }
 0x1aa   :  { %1936 = vmatmul.mubr.bf16.vlgmr.msra.gmra.mrb[4].mxu0 %v1636_v28  ;;  %1976 = vmatmul.mubr.bf16.vlgmr.msra.gmra.mrb[4].mxu1 %v1638_v29 }
 0x27d   :  { %v2262_v30 = vpop.f32.mrb[4].mxu0  ;;  %v2284_v31 = vpop.f32.mrb[4].mxu1 }
 0x27e   :  { %v2263_v33 = vpop.f32.mrb[5].mxu0  ;;  %v2285_v34 = vpop.f32.mrb[5].mxu1 }
 0x27f   :  { %v2264_v18 = vadd.f32 %v2263_v33, %v2262_v30  ;;  %v2286_v35 = vadd.f32 %v2285_v34, %v2284_v31  ;;  %v2265_v36 = vpop.f32.mrb[6].mxu0  ;;  %v2287_v37 = vpop.f32.mrb[6].mxu1 }
 0x280   :  { %v2266_v19 = vpop.f32.mrb[7].mxu0  ;;  %v2288_v38 = vpop.f32.mrb[7].mxu1 }
 0x281   :  { %v1938_v39 = vadd.f32 %v2264_v18, %v2213_v32 }
 0x283   :  { %v1978_v40 = vadd.f32 %v2286_v35, %v1938_v39 }
 0x285   :  { %v1984_v41 = vsel %vm1983_vm1, %v1978_v40, -inf }
 0x286   :  { %1985 = vmax.xlane.f32.xlu0 %v1984_v41 }
 0x313   :  { %v1986_v43 = vpop.xlane.xlu0 %1985 }
 0x314   :  { %v1987_v44 = vsub.f32 %v1978_v40, %v1986_v43 }
 0x316   :  { %v1988_v45 = vmul.f32 1.442695, %v1987_v44 }
 0x318   :  { %2654 = vpow2.f32 %v1988_v45 }
 0x322   :  { %v2655_v46 = vpop.eup %2654 }
 0x323   :  { %v1990_v47 = vsel %vm1983_vm1, %v2655_v46, 0.0 }
 0x324   :  { %1991 = vadd.xlane.f32.xlu0 %v1990_v47 }
 0x3b1   :  { %v1992_v48 = vpop.xlane.xlu0 %1991 }
 0x3b2   :  { %2656 = vlog2.f32 %v1992_v48 }
 0x3bc   :  { %v2657_v49 = vpop.eup %2656 }
 0x3bd   :  { %v1994_v50 = vmul.f32 0.6931472, %v2657_v49 }
 0x3bf   :  { %v1995_v51 = vsub.f32 %v1987_v44, %v1994_v50 }
 0x3c1   :  { %1996 = vst [vmem:[#allocation2] sm:$0x3] %v1995_v51 }
 0x3c2   :  { %2669 = shalt.err (!%p2666_p4)
}
 0x3c3   :  { %s2670_s22 = scalar_lea.hbm %s3460_s5, 32 }
 0x3c4   :  { %p2671_p5 = scmp.ne.s32.totalorder %s3460_s5, %s2670_s22  ;;  %p2674_p6 = scmp.lt.u32.totalorder %s2670_s22, %s3460_s5 }
 0x3c6   :  { %p2676_p7 = pnand %p2674_p6, %p2671_p5 }
 0x3c8   :  { %2679 = shalt.err (!%p2676_p7)
}
 0x3c9   :  { %2006 = dma.vmem_to_hbm [thread:$0]  %s2004_s19, 32, %s3460_s5, [#allocation3]  }
 0x3ca   :  { %2680 = dma.done.wait [#allocation3], 32  }
 0x3cb   :  { %2681 = vsyncadd [#allocation3], 4294967264 }
 0x3cc   :  { %2010 = vsyncpa [#allocation3], 1 }

</bundles_post_ra>
